<compile_context>
chip_gen: v7x
topology: tpu7x:2x2x1
jax: 0.10.0
libtpu: 0.0.40
codegen_flags: <defaults>
</compile_context>

<pallas_src>
import functools

import jax
import jax.numpy as jnp
import numpy as np
from jax.experimental import pallas as pl
from jax.experimental.pallas import tpu as pltpu


def _gelu(x):
  # tanh-approx GELU (one EUP tanh on the critical chain).  The torch
  # reference uses exact-erf GELU; worst-case abs deviation ~1e-3.
  c0 = 0.7978845608028654  # sqrt(2/pi)
  return 0.5 * x * (1.0 + jnp.tanh(c0 * (x + 0.044715 * (x * x * x))))


def _leaky(x):
  return jnp.where(x > 0.0, x, 0.01 * x)


def _im2col3x3(img, masks, img_w, hw):
  """(rows, HW) image -> (9*rows, HW) im2col for a 3x3 / pad=1 conv.

  The flattened image is zero-padded once on the lane axis (W+1 zeros each
  side); each tap is then a static lane slice of the padded slab multiplied
  by a precomputed (1, HW) border mask (which kills row-wrap and off-image
  reads).  The caller finishes the conv with a single weight GEMM against the
  returned (9*rows, HW) stack — no HWxHW shift matrices, no per-tap matmuls.
  """
  rows = img.shape[0]
  pad = img_w + 1
  z = jnp.zeros((rows, pad), jnp.float32)
  padded = jnp.concatenate([z, img, z], axis=1)           # (rows, HW + 2*pad)
  slabs = []
  for ky in range(3):
    for kx in range(3):
      t = ky * 3 + kx
      s = (ky - 1) * img_w + (kx - 1)
      tap = padded[:, pad + s:pad + s + hw]                # static lane slice
      slabs.append(tap * masks[t:t + 1, :])
  return jnp.concatenate(slabs, axis=0)                    # (9*rows, HW)


def _fused_kernel(x_ref, y_ref, masks_ref,
                  wh_ref, bh_ref, dwh_ref, pwh_ref,
                  wl_ref, bl_ref, dwl_ref, pwl_ref,
                  msum_ref, mexp_ref,
                  wpool_ref, bpool_ref,
                  w1_ref, b1_ref, w2_ref, b2_ref,
                  wbc_ref, bns_ref, bnb_ref,
                  o_ref, *, img_w):
  f32 = jnp.float32
  g = msum_ref.shape[0]          # images processed in this grid step
  gc = x_ref.shape[0]            # g * C
  c = gc // g
  hw = x_ref.shape[1]

  x = x_ref[...]                 # (g*C, HW)  batch stacked on sublanes
  y = y_ref[...]                 # (g*L, HW)
  masks = masks_ref[...]         # (9, HW)

  # ---- x branch: conv1x1_h (bias) -> depthwise 1x1 -> pointwise 1x1 ----
  xh = jnp.dot(wh_ref[...], x, preferred_element_type=f32) + bh_ref[...]
  xh = xh * dwh_ref[...]                       # depthwise 1x1 == per-row scale
  x1 = jnp.dot(pwh_ref[...], xh, preferred_element_type=f32)       # (g*C, HW)

  # ---- y branch: conv1x1_l (bias) -> depthwise 1x1 -> pointwise L -> 1 ----
  yl = jnp.dot(wl_ref[...], y, preferred_element_type=f32) + bl_ref[...]
  yl = yl * dwl_ref[...]
  y1 = jnp.dot(pwl_ref[...], yl, preferred_element_type=f32)        # (g, HW)

  # ---- cosine similarity along channels (y1 broadcast over C) ----
  # torch semantics: dot / (max(||x1||, eps) * max(||y1_bcast||, eps)),
  # with ||y1_bcast|| = sqrt(C) * |y1| and dot = y1 * sum_c x1.
  sum_x1 = jnp.dot(msum_ref[...], x1, preferred_element_type=f32)   # (g, HW)
  sum_x1sq = jnp.dot(msum_ref[...], x1 * x1, preferred_element_type=f32)
  eps = 1e-8
  norm_x = jnp.sqrt(sum_x1sq)
  norm_y = jnp.sqrt(float(c)) * jnp.abs(y1)
  cos = (y1 * sum_x1) / (jnp.maximum(norm_x, eps) * jnp.maximum(norm_y, eps))

  # x2 = x1 + 0.5*(1-cos)*y1 (cos, y1 broadcast over C via block expansion)
  mod = 0.5 * (1.0 - cos) * y1                                       # (g, HW)
  x2 = x1 + jnp.dot(mexp_ref[...], mod, preferred_element_type=f32)  # (g*C, HW)

  # per-image channel mean / max
  xap = jnp.dot(msum_ref[...], x2, preferred_element_type=f32) * (1.0 / float(c))
  xmp = jnp.concatenate(
      [jnp.max(x2[i * c:(i + 1) * c, :], axis=0, keepdims=True)
       for i in range(g)], axis=0)                                   # (g, HW)

  # ---- conv1x1_pool: 3x3 conv (pad=1), C -> 2, with bias: ONE GEMM ----
  col_x2 = _im2col3x3(x2, masks, img_w, hw)                          # (9gC, HW)
  pool = (jnp.dot(wpool_ref[...], col_x2, preferred_element_type=f32)
          + bpool_ref[...])                   # (2g, HW), rows ordered [o*g + i]

  # ---- mlp1: Linear(4HW->4HW)+GELU, Linear(4HW->HW)+LeakyReLU, M = g ----
  xc = jnp.concatenate([xap, pool[0:g, :], pool[g:2 * g, :], xmp], axis=1)
  h1 = jnp.dot(xc, w1_ref[...], preferred_element_type=f32) + b1_ref[...]
  h1 = _gelu(h1)
  xw = jnp.dot(h1, w2_ref[...], preferred_element_type=f32) + b2_ref[...]
  xw = _leaky(xw)                                                     # (g, HW)

  # ---- x3 = xw * x2 ; xout = x3 + x1 ----
  xout = jnp.dot(mexp_ref[...], xw, preferred_element_type=f32) * x2 + x1

  # ---- bconv2d: 3x3 conv (no bias) + folded BN (eval) + LeakyReLU ----
  # TODO(synk): BatchNorm is folded with running stats (eval mode); training
  # mode batch statistics are not computed.
  col_out = _im2col3x3(xout, masks, img_w, hw)                       # (9gC, HW)
  conv = jnp.dot(wbc_ref[...], col_out, preferred_element_type=f32)  # (g*COUT, HW)
  out = conv * bns_ref[...] + bnb_ref[...]
  o_ref[...] = _leaky(out)


def prepare_params(params, h, w, images_per_step):
  """One-time weight re-layout / block-diag folding (run OUTSIDE jit)."""
  g = images_per_step
  c = params["wh"].shape[0]
  l = params["wl"].shape[0]
  cout = params["wbc"].shape[0]
  hw = h * w
  assert params["w1"].shape[1] == 4 * hw, "mlp1 expects 4*H*W input features"
  f32 = np.float32

  def npf(a):
    return np.asarray(a, dtype=f32)

  eye_g = np.eye(g, dtype=f32)

  def bdiag(m):
    return np.kron(eye_g, npf(m))

  def tile_col(v):
    return np.tile(npf(v).reshape(-1, 1), (g, 1))

  # per-tap border masks (9, HW): 1 where the 3x3/pad=1 tap reads in-image.
  masks = np.zeros((9, hw), f32)
  for ky in range(3):
    for kx in range(3):
      t = ky * 3 + kx
      for yy in range(h):
        for xx in range(w):
          if 0 <= yy + ky - 1 < h and 0 <= xx + kx - 1 < w:
            masks[t, yy * w + xx] = 1.0

  # 3x3 conv weights laid out against the im2col stack:
  # column index = t*(g*C) + i*C + cin, output row index = row_of(o, i).
  def conv_bd(w_oihw, n_out, row_of):
    wnp = npf(w_oihw)
    mat = np.zeros((n_out * g, 9 * g * c), f32)
    for o in range(n_out):
      for i in range(g):
        r = row_of(o, i)
        for ky in range(3):
          for kx in range(3):
            t = ky * 3 + kx
            for cc in range(c):
              mat[r, t * g * c + i * c + cc] = wnp[o, cc, ky, kx]
    return mat

  wpool_bd = conv_bd(params["wpool"], 2, lambda o, i: o * g + i)
  wbc_bd = conv_bd(params["wbc"], cout, lambda o, i: i * cout + o)

  bpool_bd = np.zeros((2 * g, 1), f32)
  for o in range(2):
    bpool_bd[o * g:(o + 1) * g, 0] = npf(params["bpool"])[o]

  inv_std = 1.0 / np.sqrt(npf(params["bn_var"]) + 1e-5)
  bn_scale = npf(params["bn_gamma"]) * inv_std
  bn_shift = npf(params["bn_beta"]) - npf(params["bn_mean"]) * bn_scale
  bns = np.tile(bn_scale.reshape(-1, 1), (g, 1))      # row i*COUT + co
  bnb = np.tile(bn_shift.reshape(-1, 1), (g, 1))

  prepped = dict(
      masks=masks,
      wh=bdiag(params["wh"]), bh=tile_col(params["bh"]),
      dwh=tile_col(params["dwh"]), pwh=bdiag(params["pwh"]),
      wl=bdiag(params["wl"]), bl=tile_col(params["bl"]),
      dwl=tile_col(params["dwl"]), pwl=np.kron(eye_g, npf(params["pwl"])),
      msum=np.kron(eye_g, np.ones((1, c), f32)),       # per-image channel sum
      mexp=np.kron(eye_g, np.ones((c, 1), f32)),       # per-image broadcast
      wpool=wpool_bd, bpool=bpool_bd,
      w1=npf(params["w1"]).T, b1=npf(params["b1"]).reshape(1, -1),
      w2=npf(params["w2"]).T, b2=npf(params["b2"]).reshape(1, -1),
      wbc=wbc_bd, bns=bns, bnb=bnb,
  )
  return {k: jnp.asarray(v) for k, v in prepped.items()}


def new_feature_align_forward(prepped, x_nchw, y_nchw):
  b, c, h, w = x_nchw.shape
  l = y_nchw.shape[1]
  hw = h * w
  g = prepped["msum"].shape[0]                  # images per grid step
  cout = prepped["wbc"].shape[0] // g
  assert b % g == 0, "batch must be a multiple of images_per_step"
  num_steps = b // g

  # NCHW -> (B*C, H*W): pure reshape (no transpose) in this layout.
  x_flat = x_nchw.reshape(num_steps * g * c, hw)
  y_flat = y_nchw.reshape(num_steps * g * l, hw)

  const_keys = ("masks", "wh", "bh", "dwh", "pwh", "wl", "bl", "dwl", "pwl",
                "msum", "mexp", "wpool", "bpool", "w1", "b1", "w2", "b2",
                "wbc", "bns", "bnb")
  consts = [prepped[k] for k in const_keys]

  in_specs = ([pl.BlockSpec((g * c, hw), lambda i: (i, 0)),
               pl.BlockSpec((g * l, hw), lambda i: (i, 0))]
              + [pl.BlockSpec(a.shape, lambda i: (0, 0)) for a in consts])

  out = pl.pallas_call(
      functools.partial(_fused_kernel, img_w=w),
      grid=(num_steps,),
      in_specs=in_specs,
      out_specs=pl.BlockSpec((g * cout, hw), lambda i: (i, 0)),
      out_shape=jax.ShapeDtypeStruct((num_steps * g * cout, hw), jnp.float32),
      compiler_params=pltpu.CompilerParams(
          dimension_semantics=("parallel",)),
  )(x_flat, y_flat, *consts)
  return out.reshape(b, cout, h, w)             # already NCHW


# ---------------------------------------------------------------------------
# Deterministic synthetic parameters (shapes mirror the module __init__).
# ---------------------------------------------------------------------------
def init_params(key, c, l, cout, n):
  ks = jax.random.split(key, 19)

  def nrm(k, shape, s):
    return (jax.random.normal(k, shape) * s).astype(jnp.float32)

  return {
      "wh": nrm(ks[0], (c, c), 0.3),            # conv1x1_h weight (Cout, Cin)
      "bh": nrm(ks[1], (c,), 0.1),              # conv1x1_h bias
      "dwh": 1.0 + nrm(ks[2], (c,), 0.3),       # deconv_h depthwise (C,1,1,1)
      "pwh": nrm(ks[3], (c, c), 0.3),           # deconv_h pointwise
      "wl": nrm(ks[4], (l, l), 0.3),            # conv1x1_l weight
      "bl": nrm(ks[5], (l,), 0.1),              # conv1x1_l bias
      "dwl": 1.0 + nrm(ks[6], (l,), 0.3),       # deconv_l depthwise
      "pwl": nrm(ks[7], (1, l), 0.3),           # deconv_l pointwise (1, L)
      "wpool": nrm(ks[8], (2, c, 3, 3), 0.2),   # conv1x1_pool weight
      "bpool": nrm(ks[9], (2,), 0.1),           # conv1x1_pool bias
      "w1": nrm(ks[10], (4 * n, 4 * n), 0.05),  # mlp1.fc1 (out, in)
      "b1": nrm(ks[11], (4 * n,), 0.05),
      "w2": nrm(ks[12], (n, 4 * n), 0.05),      # mlp1.fc2 (out, in)
      "b2": nrm(ks[13], (n,), 0.05),
      "wbc": nrm(ks[14], (cout, c, 3, 3), 0.2),  # bconv2d conv (no bias)
      "bn_gamma": 1.0 + nrm(ks[15], (cout,), 0.1),
      "bn_beta": nrm(ks[16], (cout,), 0.1),
      "bn_mean": nrm(ks[17], (cout,), 0.1),
      "bn_var": 1.0 + jnp.abs(nrm(ks[18], (cout,), 0.2)),
  }


if __name__ == "__main__":
  B, C, L, COUT = 2, 4, 3, 8
  H = W = 9  # mlp1 expects 4*9*9 input features (index=None path)
  key = jax.random.PRNGKey(0)
  kx, ky, kp = jax.random.split(key, 3)
  x = jax.random.normal(kx, (B, C, H, W), dtype=jnp.float32)
  y = jax.random.normal(ky, (B, L, H, W), dtype=jnp.float32)
  params = init_params(kp, C, L, COUT, H * W)

  # Fold the whole batch into ONE grid step (batch on sublanes, block-diag
  # weights) — best on v5e/v6e.  On v7x with B >= 2, build with
  # images_per_step = B // 2 so two "parallel" steps shard across the 2 TCs.
  prepped = prepare_params(params, H, W, images_per_step=B)

  fwd = jax.jit(new_feature_align_forward)
  out = jax.block_until_ready(fwd(prepped, x, y))
  assert out.shape == (B, COUT, H, W) and out.dtype == jnp.float32
  assert bool(jnp.all(jnp.isfinite(out)))
  print("KERNEL_OK")
</pallas_src>

<mosaic_0001>
module attributes {stable_mosaic.version = 11 : i64} {
  func.func @_fused_kernel(%arg0: i32, %arg1: memref<8x81xf32, #tpu.memory_space<vmem>>, %arg2: memref<6x81xf32, #tpu.memory_space<vmem>>, %arg3: memref<9x81xf32, #tpu.memory_space<vmem>>, %arg4: memref<8x8xf32, #tpu.memory_space<vmem>>, %arg5: memref<8x1xf32, #tpu.memory_space<vmem>>, %arg6: memref<8x1xf32, #tpu.memory_space<vmem>>, %arg7: memref<8x8xf32, #tpu.memory_space<vmem>>, %arg8: memref<6x6xf32, #tpu.memory_space<vmem>>, %arg9: memref<6x1xf32, #tpu.memory_space<vmem>>, %arg10: memref<6x1xf32, #tpu.memory_space<vmem>>, %arg11: memref<2x6xf32, #tpu.memory_space<vmem>>, %arg12: memref<2x8xf32, #tpu.memory_space<vmem>>, %arg13: memref<8x2xf32, #tpu.memory_space<vmem>>, %arg14: memref<4x72xf32, #tpu.memory_space<vmem>>, %arg15: memref<4x1xf32, #tpu.memory_space<vmem>>, %arg16: memref<324x324xf32, #tpu.memory_space<vmem>>, %arg17: memref<1x324xf32, #tpu.memory_space<vmem>>, %arg18: memref<324x81xf32, #tpu.memory_space<vmem>>, %arg19: memref<1x81xf32, #tpu.memory_space<vmem>>, %arg20: memref<16x72xf32, #tpu.memory_space<vmem>>, %arg21: memref<16x1xf32, #tpu.memory_space<vmem>>, %arg22: memref<16x1xf32, #tpu.memory_space<vmem>>, %arg23: memref<16x81xf32, #tpu.memory_space<vmem>>) attributes {dimension_semantics = [#tpu.dimension_semantics<parallel>], iteration_bounds = array<i64: 1>, scalar_prefetch = 0 : i64, scratch_operands = 0 : i64, tpu.core_type = #tpu.core_type<tc>, window_params = [{transform_indices = @transform_0, window_bounds = array<i64: 8, 81>}, {transform_indices = @transform_1, window_bounds = array<i64: 6, 81>}, {pipeline_mode = #tpu.pipeline_mode<synchronous>, transform_indices = @transform_2, window_bounds = array<i64: 9, 81>}, {pipeline_mode = #tpu.pipeline_mode<synchronous>, transform_indices = @transform_3, window_bounds = array<i64: 8, 8>}, {pipeline_mode = #tpu.pipeline_mode<synchronous>, transform_indices = @transform_4, window_bounds = array<i64: 8, 1>}, {pipeline_mode = #tpu.pipeline_mode<synchronous>, transform_indices = @transform_5, window_bounds = array<i64: 8, 1>}, {pipeline_mode = #tpu.pipeline_mode<synchronous>, transform_indices = @transform_6, window_bounds = array<i64: 8, 8>}, {pipeline_mode = #tpu.pipeline_mode<synchronous>, transform_indices = @transform_7, window_bounds = array<i64: 6, 6>}, {pipeline_mode = #tpu.pipeline_mode<synchronous>, transform_indices = @transform_8, window_bounds = array<i64: 6, 1>}, {pipeline_mode = #tpu.pipeline_mode<synchronous>, transform_indices = @transform_9, window_bounds = array<i64: 6, 1>}, {pipeline_mode = #tpu.pipeline_mode<synchronous>, transform_indices = @transform_10, window_bounds = array<i64: 2, 6>}, {pipeline_mode = #tpu.pipeline_mode<synchronous>, transform_indices = @transform_11, window_bounds = array<i64: 2, 8>}, {pipeline_mode = #tpu.pipeline_mode<synchronous>, transform_indices = @transform_12, window_bounds = array<i64: 8, 2>}, {pipeline_mode = #tpu.pipeline_mode<synchronous>, transform_indices = @transform_13, window_bounds = array<i64: 4, 72>}, {pipeline_mode = #tpu.pipeline_mode<synchronous>, transform_indices = @transform_14, window_bounds = array<i64: 4, 1>}, {pipeline_mode = #tpu.pipeline_mode<synchronous>, transform_indices = @transform_15, window_bounds = array<i64: 324, 324>}, {pipeline_mode = #tpu.pipeline_mode<synchronous>, transform_indices = @transform_16, window_bounds = array<i64: 1, 324>}, {pipeline_mode = #tpu.pipeline_mode<synchronous>, transform_indices = @transform_17, window_bounds = array<i64: 324, 81>}, {pipeline_mode = #tpu.pipeline_mode<synchronous>, transform_indices = @transform_18, window_bounds = array<i64: 1, 81>}, {pipeline_mode = #tpu.pipeline_mode<synchronous>, transform_indices = @transform_19, window_bounds = array<i64: 16, 72>}, {pipeline_mode = #tpu.pipeline_mode<synchronous>, transform_indices = @transform_20, window_bounds = array<i64: 16, 1>}, {pipeline_mode = #tpu.pipeline_mode<synchronous>, transform_indices = @transform_21, window_bounds = array<i64: 16, 1>}, {transform_indices = @transform_22, window_bounds = array<i64: 16, 81>}]} {
    %c0 = arith.constant 0 : index
    %c0_0 = arith.constant 0 : index
    %0 = vector.load %arg1[%c0, %c0_0] : memref<8x81xf32, #tpu.memory_space<vmem>>, vector<8x81xf32>
    %c0_1 = arith.constant 0 : index
    %c0_2 = arith.constant 0 : index
    %1 = vector.load %arg2[%c0_1, %c0_2] : memref<6x81xf32, #tpu.memory_space<vmem>>, vector<6x81xf32>
    %c0_3 = arith.constant 0 : index
    %c0_4 = arith.constant 0 : index
    %2 = vector.load %arg3[%c0_3, %c0_4] : memref<9x81xf32, #tpu.memory_space<vmem>>, vector<9x81xf32>
    %c0_5 = arith.constant 0 : index
    %c0_6 = arith.constant 0 : index
    %3 = vector.load %arg4[%c0_5, %c0_6] : memref<8x8xf32, #tpu.memory_space<vmem>>, vector<8x8xf32>
    %cst = arith.constant dense<0.000000e+00> : vector<8x81xf32>
    %4 = tpu.matmul %3, %0, %cst {dimension_numbers = #tpu.dot_dimension_numbers<[1], [0], [0], [1], [0, 0, 1, 1], [], []>} : vector<8x8xf32>, vector<8x81xf32>, vector<8x81xf32> -> vector<8x81xf32>
    %c0_7 = arith.constant 0 : index
    %c0_8 = arith.constant 0 : index
    %5 = vector.load %arg5[%c0_7, %c0_8] : memref<8x1xf32, #tpu.memory_space<vmem>>, vector<8x1xf32>
    %6 = vector.broadcast %5 : vector<8x1xf32> to vector<8x81xf32>
    %7 = arith.addf %4, %6 : vector<8x81xf32>
    %c0_9 = arith.constant 0 : index
    %c0_10 = arith.constant 0 : index
    %8 = vector.load %arg6[%c0_9, %c0_10] : memref<8x1xf32, #tpu.memory_space<vmem>>, vector<8x1xf32>
    %9 = vector.broadcast %8 : vector<8x1xf32> to vector<8x81xf32>
    %10 = arith.mulf %7, %9 : vector<8x81xf32>
    %c0_11 = arith.constant 0 : index
    %c0_12 = arith.constant 0 : index
    %11 = vector.load %arg7[%c0_11, %c0_12] : memref<8x8xf32, #tpu.memory_space<vmem>>, vector<8x8xf32>
    %cst_13 = arith.constant dense<0.000000e+00> : vector<8x81xf32>
    %12 = tpu.matmul %11, %10, %cst_13 {dimension_numbers = #tpu.dot_dimension_numbers<[1], [0], [0], [1], [0, 0, 1, 1], [], []>} : vector<8x8xf32>, vector<8x81xf32>, vector<8x81xf32> -> vector<8x81xf32>
    %c0_14 = arith.constant 0 : index
    %c0_15 = arith.constant 0 : index
    %13 = vector.load %arg8[%c0_14, %c0_15] : memref<6x6xf32, #tpu.memory_space<vmem>>, vector<6x6xf32>
    %cst_16 = arith.constant dense<0.000000e+00> : vector<6x81xf32>
    %14 = tpu.matmul %13, %1, %cst_16 {dimension_numbers = #tpu.dot_dimension_numbers<[1], [0], [0], [1], [0, 0, 1, 1], [], []>} : vector<6x6xf32>, vector<6x81xf32>, vector<6x81xf32> -> vector<6x81xf32>
    %c0_17 = arith.constant 0 : index
    %c0_18 = arith.constant 0 : index
    %15 = vector.load %arg9[%c0_17, %c0_18] : memref<6x1xf32, #tpu.memory_space<vmem>>, vector<6x1xf32>
    %16 = vector.broadcast %15 : vector<6x1xf32> to vector<6x81xf32>
    %17 = arith.addf %14, %16 : vector<6x81xf32>
    %c0_19 = arith.constant 0 : index
    %c0_20 = arith.constant 0 : index
    %18 = vector.load %arg10[%c0_19, %c0_20] : memref<6x1xf32, #tpu.memory_space<vmem>>, vector<6x1xf32>
    %19 = vector.broadcast %18 : vector<6x1xf32> to vector<6x81xf32>
    %20 = arith.mulf %17, %19 : vector<6x81xf32>
    %c0_21 = arith.constant 0 : index
    %c0_22 = arith.constant 0 : index
    %21 = vector.load %arg11[%c0_21, %c0_22] : memref<2x6xf32, #tpu.memory_space<vmem>>, vector<2x6xf32>
    %cst_23 = arith.constant dense<0.000000e+00> : vector<2x81xf32>
    %22 = tpu.matmul %21, %20, %cst_23 {dimension_numbers = #tpu.dot_dimension_numbers<[1], [0], [0], [1], [0, 0, 1, 1], [], []>} : vector<2x6xf32>, vector<6x81xf32>, vector<2x81xf32> -> vector<2x81xf32>
    %c0_24 = arith.constant 0 : index
    %c0_25 = arith.constant 0 : index
    %23 = vector.load %arg12[%c0_24, %c0_25] : memref<2x8xf32, #tpu.memory_space<vmem>>, vector<2x8xf32>
    %cst_26 = arith.constant dense<0.000000e+00> : vector<2x81xf32>
    %24 = tpu.matmul %23, %12, %cst_26 {dimension_numbers = #tpu.dot_dimension_numbers<[1], [0], [0], [1], [0, 0, 1, 1], [], []>} : vector<2x8xf32>, vector<8x81xf32>, vector<2x81xf32> -> vector<2x81xf32>
    %c0_27 = arith.constant 0 : index
    %c0_28 = arith.constant 0 : index
    %25 = vector.load %arg12[%c0_27, %c0_28] : memref<2x8xf32, #tpu.memory_space<vmem>>, vector<2x8xf32>
    %26 = arith.mulf %12, %12 : vector<8x81xf32>
    %cst_29 = arith.constant dense<0.000000e+00> : vector<2x81xf32>
    %27 = tpu.matmul %25, %26, %cst_29 {dimension_numbers = #tpu.dot_dimension_numbers<[1], [0], [0], [1], [0, 0, 1, 1], [], []>} : vector<2x8xf32>, vector<8x81xf32>, vector<2x81xf32> -> vector<2x81xf32>
    %28 = math.sqrt %27 : vector<2x81xf32>
    %cst_30 = arith.constant 4.000000e+00 : f32
    %29 = math.sqrt %cst_30 : f32
    %30 = math.absf %22 : vector<2x81xf32>
    %31 = vector.broadcast %29 : f32 to vector<2x81xf32>
    %32 = arith.mulf %31, %30 : vector<2x81xf32>
    %33 = arith.mulf %22, %24 : vector<2x81xf32>
    %cst_31 = arith.constant 9.99999993E-9 : f32
    %34 = vector.broadcast %cst_31 : f32 to vector<2x81xf32>
    %35 = arith.maximumf %28, %34 : vector<2x81xf32>
    %cst_32 = arith.constant 9.99999993E-9 : f32
    %36 = vector.broadcast %cst_32 : f32 to vector<2x81xf32>
    %37 = arith.maximumf %32, %36 : vector<2x81xf32>
    %38 = arith.mulf %35, %37 : vector<2x81xf32>
    %39 = arith.divf %33, %38 : vector<2x81xf32>
    %cst_33 = arith.constant 1.000000e+00 : f32
    %40 = vector.broadcast %cst_33 : f32 to vector<2x81xf32>
    %41 = arith.subf %40, %39 : vector<2x81xf32>
    %cst_34 = arith.constant 5.000000e-01 : f32
    %42 = vector.broadcast %cst_34 : f32 to vector<2x81xf32>
    %43 = arith.mulf %42, %41 : vector<2x81xf32>
    %44 = arith.mulf %43, %22 : vector<2x81xf32>
    %c0_35 = arith.constant 0 : index
    %c0_36 = arith.constant 0 : index
    %45 = vector.load %arg13[%c0_35, %c0_36] : memref<8x2xf32, #tpu.memory_space<vmem>>, vector<8x2xf32>
    %cst_37 = arith.constant dense<0.000000e+00> : vector<8x81xf32>
    %46 = tpu.matmul %45, %44, %cst_37 {dimension_numbers = #tpu.dot_dimension_numbers<[1], [0], [0], [1], [0, 0, 1, 1], [], []>} : vector<8x2xf32>, vector<2x81xf32>, vector<8x81xf32> -> vector<8x81xf32>
    %47 = arith.addf %12, %46 : vector<8x81xf32>
    %c0_38 = arith.constant 0 : index
    %c0_39 = arith.constant 0 : index
    %48 = vector.load %arg12[%c0_38, %c0_39] : memref<2x8xf32, #tpu.memory_space<vmem>>, vector<2x8xf32>
    %cst_40 = arith.constant dense<0.000000e+00> : vector<2x81xf32>
    %49 = tpu.matmul %48, %47, %cst_40 {dimension_numbers = #tpu.dot_dimension_numbers<[1], [0], [0], [1], [0, 0, 1, 1], [], []>} : vector<2x8xf32>, vector<8x81xf32>, vector<2x81xf32> -> vector<2x81xf32>
    %cst_41 = arith.constant 2.500000e-01 : f32
    %50 = vector.broadcast %cst_41 : f32 to vector<2x81xf32>
    %51 = arith.mulf %49, %50 : vector<2x81xf32>
    %52 = vector.extract_strided_slice %47 {offsets = [0, 0], sizes = [4, 81], strides = [1, 1]} : vector<8x81xf32> to vector<4x81xf32>
    %cst_42 = arith.constant dense<0xFF800000> : vector<81xf32>
    %53 = vector.multi_reduction <maximumf>, %52, %cst_42 [0] : vector<4x81xf32> to vector<81xf32>
    %54 = vector.shape_cast %53 : vector<81xf32> to vector<1x81xf32>
    %55 = vector.extract_strided_slice %47 {offsets = [4, 0], sizes = [4, 81], strides = [1, 1]} : vector<8x81xf32> to vector<4x81xf32>
    %cst_43 = arith.constant dense<0xFF800000> : vector<81xf32>
    %56 = vector.multi_reduction <maximumf>, %55, %cst_43 [0] : vector<4x81xf32> to vector<81xf32>
    %57 = vector.shape_cast %56 : vector<81xf32> to vector<1x81xf32>
    %58 = tpu.concatenate %54, %57 in 0 : vector<1x81xf32>, vector<1x81xf32> -> vector<2x81xf32>
    %cst_44 = arith.constant 0.000000e+00 : f32
    %59 = vector.broadcast %cst_44 : f32 to vector<8x10xf32>
    %60 = tpu.concatenate %59, %47, %59 in 1 : vector<8x10xf32>, vector<8x81xf32>, vector<8x10xf32> -> vector<8x101xf32>
    %61 = vector.extract_strided_slice %60 {offsets = [0, 0], sizes = [8, 81], strides = [1, 1]} : vector<8x101xf32> to vector<8x81xf32>
    %62 = vector.extract_strided_slice %2 {offsets = [0, 0], sizes = [1, 81], strides = [1, 1]} : vector<9x81xf32> to vector<1x81xf32>
    %63 = vector.broadcast %62 : vector<1x81xf32> to vector<8x81xf32>
    %64 = arith.mulf %61, %63 : vector<8x81xf32>
    %65 = vector.extract_strided_slice %60 {offsets = [0, 1], sizes = [8, 81], strides = [1, 1]} : vector<8x101xf32> to vector<8x81xf32>
    %66 = vector.extract_strided_slice %2 {offsets = [1, 0], sizes = [1, 81], strides = [1, 1]} : vector<9x81xf32> to vector<1x81xf32>
    %67 = vector.broadcast %66 : vector<1x81xf32> to vector<8x81xf32>
    %68 = arith.mulf %65, %67 : vector<8x81xf32>
    %69 = vector.extract_strided_slice %60 {offsets = [0, 2], sizes = [8, 81], strides = [1, 1]} : vector<8x101xf32> to vector<8x81xf32>
    %70 = vector.extract_strided_slice %2 {offsets = [2, 0], sizes = [1, 81], strides = [1, 1]} : vector<9x81xf32> to vector<1x81xf32>
    %71 = vector.broadcast %70 : vector<1x81xf32> to vector<8x81xf32>
    %72 = arith.mulf %69, %71 : vector<8x81xf32>
    %73 = vector.extract_strided_slice %60 {offsets = [0, 9], sizes = [8, 81], strides = [1, 1]} : vector<8x101xf32> to vector<8x81xf32>
    %74 = vector.extract_strided_slice %2 {offsets = [3, 0], sizes = [1, 81], strides = [1, 1]} : vector<9x81xf32> to vector<1x81xf32>
    %75 = vector.broadcast %74 : vector<1x81xf32> to vector<8x81xf32>
    %76 = arith.mulf %73, %75 : vector<8x81xf32>
    %77 = vector.extract_strided_slice %60 {offsets = [0, 10], sizes = [8, 81], strides = [1, 1]} : vector<8x101xf32> to vector<8x81xf32>
    %78 = vector.extract_strided_slice %2 {offsets = [4, 0], sizes = [1, 81], strides = [1, 1]} : vector<9x81xf32> to vector<1x81xf32>
    %79 = vector.broadcast %78 : vector<1x81xf32> to vector<8x81xf32>
    %80 = arith.mulf %77, %79 : vector<8x81xf32>
    %81 = vector.extract_strided_slice %60 {offsets = [0, 11], sizes = [8, 81], strides = [1, 1]} : vector<8x101xf32> to vector<8x81xf32>
    %82 = vector.extract_strided_slice %2 {offsets = [5, 0], sizes = [1, 81], strides = [1, 1]} : vector<9x81xf32> to vector<1x81xf32>
    %83 = vector.broadcast %82 : vector<1x81xf32> to vector<8x81xf32>
    %84 = arith.mulf %81, %83 : vector<8x81xf32>
    %85 = vector.extract_strided_slice %60 {offsets = [0, 18], sizes = [8, 81], strides = [1, 1]} : vector<8x101xf32> to vector<8x81xf32>
    %86 = vector.extract_strided_slice %2 {offsets = [6, 0], sizes = [1, 81], strides = [1, 1]} : vector<9x81xf32> to vector<1x81xf32>
    %87 = vector.broadcast %86 : vector<1x81xf32> to vector<8x81xf32>
    %88 = arith.mulf %85, %87 : vector<8x81xf32>
    %89 = vector.extract_strided_slice %60 {offsets = [0, 19], sizes = [8, 81], strides = [1, 1]} : vector<8x101xf32> to vector<8x81xf32>
    %90 = vector.extract_strided_slice %2 {offsets = [7, 0], sizes = [1, 81], strides = [1, 1]} : vector<9x81xf32> to vector<1x81xf32>
    %91 = vector.broadcast %90 : vector<1x81xf32> to vector<8x81xf32>
    %92 = arith.mulf %89, %91 : vector<8x81xf32>
    %93 = vector.extract_strided_slice %60 {offsets = [0, 20], sizes = [8, 81], strides = [1, 1]} : vector<8x101xf32> to vector<8x81xf32>
    %94 = vector.extract_strided_slice %2 {offsets = [8, 0], sizes = [1, 81], strides = [1, 1]} : vector<9x81xf32> to vector<1x81xf32>
    %95 = vector.broadcast %94 : vector<1x81xf32> to vector<8x81xf32>
    %96 = arith.mulf %93, %95 : vector<8x81xf32>
    %97 = tpu.concatenate %64, %68, %72, %76, %80, %84, %88, %92, %96 in 0 : vector<8x81xf32>, vector<8x81xf32>, vector<8x81xf32>, vector<8x81xf32>, vector<8x81xf32>, vector<8x81xf32>, vector<8x81xf32>, vector<8x81xf32>, vector<8x81xf32> -> vector<72x81xf32>
    %c0_45 = arith.constant 0 : index
    %c0_46 = arith.constant 0 : index
    %98 = vector.load %arg14[%c0_45, %c0_46] : memref<4x72xf32, #tpu.memory_space<vmem>>, vector<4x72xf32>
    %cst_47 = arith.constant dense<0.000000e+00> : vector<4x81xf32>
    %99 = tpu.matmul %98, %97, %cst_47 {dimension_numbers = #tpu.dot_dimension_numbers<[1], [0], [0], [1], [0, 0, 1, 1], [], []>} : vector<4x72xf32>, vector<72x81xf32>, vector<4x81xf32> -> vector<4x81xf32>
    %c0_48 = arith.constant 0 : index
    %c0_49 = arith.constant 0 : index
    %100 = vector.load %arg15[%c0_48, %c0_49] : memref<4x1xf32, #tpu.memory_space<vmem>>, vector<4x1xf32>
    %101 = vector.broadcast %100 : vector<4x1xf32> to vector<4x81xf32>
    %102 = arith.addf %99, %101 : vector<4x81xf32>
    %103 = vector.extract_strided_slice %102 {offsets = [0, 0], sizes = [2, 81], strides = [1, 1]} : vector<4x81xf32> to vector<2x81xf32>
    %104 = vector.extract_strided_slice %102 {offsets = [2, 0], sizes = [2, 81], strides = [1, 1]} : vector<4x81xf32> to vector<2x81xf32>
    %105 = tpu.concatenate %51, %103, %104, %58 in 1 : vector<2x81xf32>, vector<2x81xf32>, vector<2x81xf32>, vector<2x81xf32> -> vector<2x324xf32>
    %c0_50 = arith.constant 0 : index
    %c0_51 = arith.constant 0 : index
    %106 = vector.load %arg16[%c0_50, %c0_51] : memref<324x324xf32, #tpu.memory_space<vmem>>, vector<324x324xf32>
    %cst_52 = arith.constant dense<0.000000e+00> : vector<2x324xf32>
    %107 = tpu.matmul %105, %106, %cst_52 {dimension_numbers = #tpu.dot_dimension_numbers<[1], [0], [0], [1], [0, 0, 1, 1], [], []>} : vector<2x324xf32>, vector<324x324xf32>, vector<2x324xf32> -> vector<2x324xf32>
    %c0_53 = arith.constant 0 : index
    %c0_54 = arith.constant 0 : index
    %108 = vector.load %arg17[%c0_53, %c0_54] : memref<1x324xf32, #tpu.memory_space<vmem>>, vector<1x324xf32>
    %109 = vector.broadcast %108 : vector<1x324xf32> to vector<2x324xf32>
    %110 = arith.addf %107, %109 : vector<2x324xf32>
    %cst_55 = arith.constant 5.000000e-01 : f32
    %111 = vector.broadcast %cst_55 : f32 to vector<2x324xf32>
    %112 = arith.mulf %111, %110 : vector<2x324xf32>
    %113 = arith.mulf %110, %110 : vector<2x324xf32>
    %114 = arith.mulf %113, %110 : vector<2x324xf32>
    %cst_56 = arith.constant 4.471500e-02 : f32
    %115 = vector.broadcast %cst_56 : f32 to vector<2x324xf32>
    %116 = arith.mulf %115, %114 : vector<2x324xf32>
    %117 = arith.addf %110, %116 : vector<2x324xf32>
    %cst_57 = arith.constant 0.797884583 : f32
    %118 = vector.broadcast %cst_57 : f32 to vector<2x324xf32>
    %119 = arith.mulf %118, %117 : vector<2x324xf32>
    %120 = math.tanh %119 : vector<2x324xf32>
    %cst_58 = arith.constant 1.000000e+00 : f32
    %121 = vector.broadcast %cst_58 : f32 to vector<2x324xf32>
    %122 = arith.addf %121, %120 : vector<2x324xf32>
    %123 = arith.mulf %112, %122 : vector<2x324xf32>
    %c0_59 = arith.constant 0 : index
    %c0_60 = arith.constant 0 : index
    %124 = vector.load %arg18[%c0_59, %c0_60] : memref<324x81xf32, #tpu.memory_space<vmem>>, vector<324x81xf32>
    %cst_61 = arith.constant dense<0.000000e+00> : vector<2x81xf32>
    %125 = tpu.matmul %123, %124, %cst_61 {dimension_numbers = #tpu.dot_dimension_numbers<[1], [0], [0], [1], [0, 0, 1, 1], [], []>} : vector<2x324xf32>, vector<324x81xf32>, vector<2x81xf32> -> vector<2x81xf32>
    %c0_62 = arith.constant 0 : index
    %c0_63 = arith.constant 0 : index
    %126 = vector.load %arg19[%c0_62, %c0_63] : memref<1x81xf32, #tpu.memory_space<vmem>>, vector<1x81xf32>
    %127 = vector.broadcast %126 : vector<1x81xf32> to vector<2x81xf32>
    %128 = arith.addf %125, %127 : vector<2x81xf32>
    %cst_64 = arith.constant 0.000000e+00 : f32
    %129 = vector.broadcast %cst_64 : f32 to vector<2x81xf32>
    %130 = arith.cmpf ogt, %128, %129 : vector<2x81xf32>
    %cst_65 = arith.constant 0.00999999977 : f32
    %131 = vector.broadcast %cst_65 : f32 to vector<2x81xf32>
    %132 = arith.mulf %131, %128 : vector<2x81xf32>
    %133 = arith.select %130, %128, %132 : vector<2x81xi1>, vector<2x81xf32>
    %c0_66 = arith.constant 0 : index
    %c0_67 = arith.constant 0 : index
    %134 = vector.load %arg13[%c0_66, %c0_67] : memref<8x2xf32, #tpu.memory_space<vmem>>, vector<8x2xf32>
    %cst_68 = arith.constant dense<0.000000e+00> : vector<8x81xf32>
    %135 = tpu.matmul %134, %133, %cst_68 {dimension_numbers = #tpu.dot_dimension_numbers<[1], [0], [0], [1], [0, 0, 1, 1], [], []>} : vector<8x2xf32>, vector<2x81xf32>, vector<8x81xf32> -> vector<8x81xf32>
    %136 = arith.mulf %135, %47 : vector<8x81xf32>
    %137 = arith.addf %136, %12 : vector<8x81xf32>
    %cst_69 = arith.constant 0.000000e+00 : f32
    %138 = vector.broadcast %cst_69 : f32 to vector<8x10xf32>
    %139 = tpu.concatenate %138, %137, %138 in 1 : vector<8x10xf32>, vector<8x81xf32>, vector<8x10xf32> -> vector<8x101xf32>
    %140 = vector.extract_strided_slice %139 {offsets = [0, 0], sizes = [8, 81], strides = [1, 1]} : vector<8x101xf32> to vector<8x81xf32>
    %141 = vector.extract_strided_slice %2 {offsets = [0, 0], sizes = [1, 81], strides = [1, 1]} : vector<9x81xf32> to vector<1x81xf32>
    %142 = vector.broadcast %141 : vector<1x81xf32> to vector<8x81xf32>
    %143 = arith.mulf %140, %142 : vector<8x81xf32>
    %144 = vector.extract_strided_slice %139 {offsets = [0, 1], sizes = [8, 81], strides = [1, 1]} : vector<8x101xf32> to vector<8x81xf32>
    %145 = vector.extract_strided_slice %2 {offsets = [1, 0], sizes = [1, 81], strides = [1, 1]} : vector<9x81xf32> to vector<1x81xf32>
    %146 = vector.broadcast %145 : vector<1x81xf32> to vector<8x81xf32>
    %147 = arith.mulf %144, %146 : vector<8x81xf32>
    %148 = vector.extract_strided_slice %139 {offsets = [0, 2], sizes = [8, 81], strides = [1, 1]} : vector<8x101xf32> to vector<8x81xf32>
    %149 = vector.extract_strided_slice %2 {offsets = [2, 0], sizes = [1, 81], strides = [1, 1]} : vector<9x81xf32> to vector<1x81xf32>
    %150 = vector.broadcast %149 : vector<1x81xf32> to vector<8x81xf32>
    %151 = arith.mulf %148, %150 : vector<8x81xf32>
    %152 = vector.extract_strided_slice %139 {offsets = [0, 9], sizes = [8, 81], strides = [1, 1]} : vector<8x101xf32> to vector<8x81xf32>
    %153 = vector.extract_strided_slice %2 {offsets = [3, 0], sizes = [1, 81], strides = [1, 1]} : vector<9x81xf32> to vector<1x81xf32>
    %154 = vector.broadcast %153 : vector<1x81xf32> to vector<8x81xf32>
    %155 = arith.mulf %152, %154 : vector<8x81xf32>
    %156 = vector.extract_strided_slice %139 {offsets = [0, 10], sizes = [8, 81], strides = [1, 1]} : vector<8x101xf32> to vector<8x81xf32>
    %157 = vector.extract_strided_slice %2 {offsets = [4, 0], sizes = [1, 81], strides = [1, 1]} : vector<9x81xf32> to vector<1x81xf32>
    %158 = vector.broadcast %157 : vector<1x81xf32> to vector<8x81xf32>
    %159 = arith.mulf %156, %158 : vector<8x81xf32>
    %160 = vector.extract_strided_slice %139 {offsets = [0, 11], sizes = [8, 81], strides = [1, 1]} : vector<8x101xf32> to vector<8x81xf32>
    %161 = vector.extract_strided_slice %2 {offsets = [5, 0], sizes = [1, 81], strides = [1, 1]} : vector<9x81xf32> to vector<1x81xf32>
    %162 = vector.broadcast %161 : vector<1x81xf32> to vector<8x81xf32>
    %163 = arith.mulf %160, %162 : vector<8x81xf32>
    %164 = vector.extract_strided_slice %139 {offsets = [0, 18], sizes = [8, 81], strides = [1, 1]} : vector<8x101xf32> to vector<8x81xf32>
    %165 = vector.extract_strided_slice %2 {offsets = [6, 0], sizes = [1, 81], strides = [1, 1]} : vector<9x81xf32> to vector<1x81xf32>
    %166 = vector.broadcast %165 : vector<1x81xf32> to vector<8x81xf32>
    %167 = arith.mulf %164, %166 : vector<8x81xf32>
    %168 = vector.extract_strided_slice %139 {offsets = [0, 19], sizes = [8, 81], strides = [1, 1]} : vector<8x101xf32> to vector<8x81xf32>
    %169 = vector.extract_strided_slice %2 {offsets = [7, 0], sizes = [1, 81], strides = [1, 1]} : vector<9x81xf32> to vector<1x81xf32>
    %170 = vector.broadcast %169 : vector<1x81xf32> to vector<8x81xf32>
    %171 = arith.mulf %168, %170 : vector<8x81xf32>
    %172 = vector.extract_strided_slice %139 {offsets = [0, 20], sizes = [8, 81], strides = [1, 1]} : vector<8x101xf32> to vector<8x81xf32>
    %173 = vector.extract_strided_slice %2 {offsets = [8, 0], sizes = [1, 81], strides = [1, 1]} : vector<9x81xf32> to vector<1x81xf32>
    %174 = vector.broadcast %173 : vector<1x81xf32> to vector<8x81xf32>
    %175 = arith.mulf %172, %174 : vector<8x81xf32>
    %176 = tpu.concatenate %143, %147, %151, %155, %159, %163, %167, %171, %175 in 0 : vector<8x81xf32>, vector<8x81xf32>, vector<8x81xf32>, vector<8x81xf32>, vector<8x81xf32>, vector<8x81xf32>, vector<8x81xf32>, vector<8x81xf32>, vector<8x81xf32> -> vector<72x81xf32>
    %c0_70 = arith.constant 0 : index
    %c0_71 = arith.constant 0 : index
    %177 = vector.load %arg20[%c0_70, %c0_71] : memref<16x72xf32, #tpu.memory_space<vmem>>, vector<16x72xf32>
    %cst_72 = arith.constant dense<0.000000e+00> : vector<16x81xf32>
    %178 = tpu.matmul %177, %176, %cst_72 {dimension_numbers = #tpu.dot_dimension_numbers<[1], [0], [0], [1], [0, 0, 1, 1], [], []>} : vector<16x72xf32>, vector<72x81xf32>, vector<16x81xf32> -> vector<16x81xf32>
    %c0_73 = arith.constant 0 : index
    %c0_74 = arith.constant 0 : index
    %179 = vector.load %arg21[%c0_73, %c0_74] : memref<16x1xf32, #tpu.memory_space<vmem>>, vector<16x1xf32>
    %180 = vector.broadcast %179 : vector<16x1xf32> to vector<16x81xf32>
    %181 = arith.mulf %178, %180 : vector<16x81xf32>
    %c0_75 = arith.constant 0 : index
    %c0_76 = arith.constant 0 : index
    %182 = vector.load %arg22[%c0_75, %c0_76] : memref<16x1xf32, #tpu.memory_space<vmem>>, vector<16x1xf32>
    %183 = vector.broadcast %182 : vector<16x1xf32> to vector<16x81xf32>
    %184 = arith.addf %181, %183 : vector<16x81xf32>
    %cst_77 = arith.constant 0.000000e+00 : f32
    %185 = vector.broadcast %cst_77 : f32 to vector<16x81xf32>
    %186 = arith.cmpf ogt, %184, %185 : vector<16x81xf32>
    %cst_78 = arith.constant 0.00999999977 : f32
    %187 = vector.broadcast %cst_78 : f32 to vector<16x81xf32>
    %188 = arith.mulf %187, %184 : vector<16x81xf32>
    %189 = arith.select %186, %184, %188 : vector<16x81xi1>, vector<16x81xf32>
    %c0_79 = arith.constant 0 : index
    %c0_80 = arith.constant 0 : index
    %190 = vector.load %arg23[%c0_79, %c0_80] : memref<16x81xf32, #tpu.memory_space<vmem>>, vector<16x81xf32>
    tpu.vector_store %arg23[%c0_79, %c0_80], %189 {strides = array<i32>} : memref<16x81xf32, #tpu.memory_space<vmem>>, vector<16x81xf32>,
    return
  }
  func.func @transform_0(%arg0: i32) -> (i32, i32) {
    %c0_i32 = arith.constant 0 : i32
    %c0_i32_0 = arith.constant 0 : i32
    return %arg0, %c0_i32 : i32, i32
  }
  func.func @transform_1(%arg0: i32) -> (i32, i32) {
    %c0_i32 = arith.constant 0 : i32
    %c0_i32_0 = arith.constant 0 : i32
    return %arg0, %c0_i32 : i32, i32
  }
  func.func @transform_2(%arg0: i32) -> (i32, i32) {
    %c0_i32 = arith.constant 0 : i32
    %c0_i32_0 = arith.constant 0 : i32
    %c0_i32_1 = arith.constant 0 : i32
    return %c0_i32, %c0_i32_0 : i32, i32
  }
  func.func @transform_3(%arg0: i32) -> (i32, i32) {
    %c0_i32 = arith.constant 0 : i32
    %c0_i32_0 = arith.constant 0 : i32
    %c0_i32_1 = arith.constant 0 : i32
    return %c0_i32, %c0_i32_0 : i32, i32
  }
  func.func @transform_4(%arg0: i32) -> (i32, i32) {
    %c0_i32 = arith.constant 0 : i32
    %c0_i32_0 = arith.constant 0 : i32
    %c0_i32_1 = arith.constant 0 : i32
    return %c0_i32, %c0_i32_0 : i32, i32
  }
  func.func @transform_5(%arg0: i32) -> (i32, i32) {
    %c0_i32 = arith.constant 0 : i32
    %c0_i32_0 = arith.constant 0 : i32
    %c0_i32_1 = arith.constant 0 : i32
    return %c0_i32, %c0_i32_0 : i32, i32
  }
  func.func @transform_6(%arg0: i32) -> (i32, i32) {
    %c0_i32 = arith.constant 0 : i32
    %c0_i32_0 = arith.constant 0 : i32
    %c0_i32_1 = arith.constant 0 : i32
    return %c0_i32, %c0_i32_0 : i32, i32
  }
  func.func @transform_7(%arg0: i32) -> (i32, i32) {
    %c0_i32 = arith.constant 0 : i32
    %c0_i32_0 = arith.constant 0 : i32
    %c0_i32_1 = arith.constant 0 : i32
    return %c0_i32, %c0_i32_0 : i32, i32
  }
  func.func @transform_8(%arg0: i32) -> (i32, i32) {
    %c0_i32 = arith.constant 0 : i32
    %c0_i32_0 = arith.constant 0 : i32
    %c0_i32_1 = arith.constant 0 : i32
    return %c0_i32, %c0_i32_0 : i32, i32
  }
  func.func @transform_9(%arg0: i32) -> (i32, i32) {
    %c0_i32 = arith.constant 0 : i32
    %c0_i32_0 = arith.constant 0 : i32
    %c0_i32_1 = arith.constant 0 : i32
    return %c0_i32, %c0_i32_0 : i32, i32
  }
  func.func @transform_10(%arg0: i32) -> (i32, i32) {
    %c0_i32 = arith.constant 0 : i32
    %c0_i32_0 = arith.constant 0 : i32
    %c0_i32_1 = arith.constant 0 : i32
    return %c0_i32, %c0_i32_0 : i32, i32
  }
  func.func @transform_11(%arg0: i32) -> (i32, i32) {
    %c0_i32 = arith.constant 0 : i32
    %c0_i32_0 = arith.constant 0 : i32
    %c0_i32_1 = arith.constant 0 : i32
    return %c0_i32, %c0_i32_0 : i32, i32
  }
  func.func @transform_12(%arg0: i32) -> (i32, i32) {
    %c0_i32 = arith.constant 0 : i32
    %c0_i32_0 = arith.constant 0 : i32
    %c0_i32_1 = arith.constant 0 : i32
    return %c0_i32, %c0_i32_0 : i32, i32
  }
  func.func @transform_13(%arg0: i32) -> (i32, i32) {
    %c0_i32 = arith.constant 0 : i32
    %c0_i32_0 = arith.constant 0 : i32
    %c0_i32_1 = arith.constant 0 : i32
    return %c0_i32, %c0_i32_0 : i32, i32
  }
  func.func @transform_14(%arg0: i32) -> (i32, i32) {
    %c0_i32 = arith.constant 0 : i32
    %c0_i32_0 = arith.constant 0 : i32
    %c0_i32_1 = arith.constant 0 : i32
    return %c0_i32, %c0_i32_0 : i32, i32
  }
  func.func @transform_15(%arg0: i32) -> (i32, i32) {
    %c0_i32 = arith.constant 0 : i32
    %c0_i32_0 = arith.constant 0 : i32
    %c0_i32_1 = arith.constant 0 : i32
    return %c0_i32, %c0_i32_0 : i32, i32
  }
  func.func @transform_16(%arg0: i32) -> (i32, i32) {
    %c0_i32 = arith.constant 0 : i32
    %c0_i32_0 = arith.constant 0 : i32
    %c0_i32_1 = arith.constant 0 : i32
    return %c0_i32, %c0_i32_0 : i32, i32
  }
  func.func @transform_17(%arg0: i32) -> (i32, i32) {
    %c0_i32 = arith.constant 0 : i32
    %c0_i32_0 = arith.constant 0 : i32
    %c0_i32_1 = arith.constant 0 : i32
    return %c0_i32, %c0_i32_0 : i32, i32
  }
  func.func @transform_18(%arg0: i32) -> (i32, i32) {
    %c0_i32 = arith.constant 0 : i32
    %c0_i32_0 = arith.constant 0 : i32
    %c0_i32_1 = arith.constant 0 : i32
    return %c0_i32, %c0_i32_0 : i32, i32
  }
  func.func @transform_19(%arg0: i32) -> (i32, i32) {
    %c0_i32 = arith.constant 0 : i32
    %c0_i32_0 = arith.constant 0 : i32
    %c0_i32_1 = arith.constant 0 : i32
    return %c0_i32, %c0_i32_0 : i32, i32
  }
  func.func @transform_20(%arg0: i32) -> (i32, i32) {
    %c0_i32 = arith.constant 0 : i32
    %c0_i32_0 = arith.constant 0 : i32
    %c0_i32_1 = arith.constant 0 : i32
    return %c0_i32, %c0_i32_0 : i32, i32
  }
  func.func @transform_21(%arg0: i32) -> (i32, i32) {
    %c0_i32 = arith.constant 0 : i32
    %c0_i32_0 = arith.constant 0 : i32
    %c0_i32_1 = arith.constant 0 : i32
    return %c0_i32, %c0_i32_0 : i32, i32
  }
  func.func @transform_22(%arg0: i32) -> (i32, i32) {
    %c0_i32 = arith.constant 0 : i32
    %c0_i32_0 = arith.constant 0 : i32
    return %arg0, %c0_i32 : i32, i32
  }
}

</mosaic_0001>

<bundles_post_ra>
// kernel: new_feature_align_forward.1
= control target key start
LH: loop header
LB: loop body
LE: loop exit
PB: predicated region body
PF: predicated region fallthrough
CT: control target
= control target key end

     0   :  { %s3670_s0 = inlined_call_operand.vmem [shape: f32[8,81], index: 0, kind: input, shape index: {}]   ;;  %s3671_s1 = inlined_call_operand.vmem [shape: f32[6,81], index: 1, kind: input, shape index: {}]   ;;  %s3672_s2 = inlined_call_operand.hbm [shape: f32[9,81], index: 2, kind: input, shape index: {}]   ;;  %s3673_s3 = inlined_call_operand.hbm [shape: f32[8,8], index: 3, kind: input, shape index: {}]   ;;  %s3674_s4 = inlined_call_operand.vmem [shape: f32[8,1], index: 4, kind: input, shape index: {}]   ;;  %s3675_s5 = inlined_call_operand.vmem [shape: f32[8,1], index: 5, kind: input, shape index: {}]   ;;  %s3676_s6 = inlined_call_operand.hbm [shape: f32[8,8], index: 6, kind: input, shape index: {}]   ;;  %s3677_s7 = inlined_call_operand.hbm [shape: f32[6,6], index: 7, kind: input, shape index: {}]   ;;  %s3678_s8 = inlined_call_operand.vmem [shape: f32[6,1], index: 8, kind: input, shape index: {}]   ;;  %s3679_s9 = inlined_call_operand.vmem [shape: f32[6,1], index: 9, kind: input, shape index: {}]   ;;  %s3680_s10 = inlined_call_operand.hbm [shape: f32[2,6], index: 10, kind: input, shape index: {}]   ;;  %s3681_s11 = inlined_call_operand.hbm [shape: f32[2,8], index: 11, kind: input, shape index: {}]   ;;  %s3682_s12 = inlined_call_operand.vmem [shape: f32[8,2], index: 12, kind: input, shape index: {}]   ;;  %s3683_s13 = inlined_call_operand.vmem [shape: f32[4,72], index: 13, kind: input, shape index: {}]   ;;  %s3684_s14 = inlined_call_operand.vmem [shape: f32[4,1], index: 14, kind: input, shape index: {}]   ;;  %s3685_s15 = inlined_call_operand.vmem [shape: f32[324,324], index: 15, kind: input, shape index: {}]   ;;  %s3686_s16 = inlined_call_operand.vmem [shape: f32[1,324], index: 16, kind: input, shape index: {}]   ;;  %s3687_s17 = inlined_call_operand.vmem [shape: f32[324,81], index: 17, kind: input, shape index: {}]   ;;  %s3688_s18 = inlined_call_operand.hbm [shape: f32[1,81], index: 18, kind: input, shape index: {}]   ;;  %s3689_s19 = inlined_call_operand.hbm [shape: f32[16,72], index: 19, kind: input, shape index: {}]   ;;  %s3690_s20 = inlined_call_operand.vmem [shape: f32[16,1], index: 20, kind: input, shape index: {}]   ;;  %s3691_s21 = inlined_call_operand.vmem [shape: f32[16,1], index: 21, kind: input, shape index: {}]   ;;  %s3692_s22 = inlined_call_operand.vmem [shape: f32[16,81], index: 22, kind: output, shape index: {}]  }
   0x1   :  { %3697 = sst [smem:[#allocation20_spill]] %s3670_s0 }
   0x2   :  { %3698 = sst [smem:[#allocation21_spill]] %s3671_s1 }
   0x3   :  { %3699 = sst [smem:[#allocation22_spill]] %s3672_s2 }
   0x4   :  { %3700 = sst [smem:[#allocation23_spill]] %s3673_s3 }
   0x5   :  { %3701 = sst [smem:[#allocation24_spill]] %s3674_s4 }
   0x6   :  { %3702 = sst [smem:[#allocation25_spill]] %s3675_s5 }
   0x7   :  { %3703 = sst [smem:[#allocation26_spill]] %s3676_s6 }
   0x8   :  { %3704 = sst [smem:[#allocation27_spill]] %s3692_s22 }
   0x9   :  { %27 = vsyncpa [#allocation3], 0 }
   0xa   :  { %28 = vsyncpa [#allocation5], 0 }
   0xb   :  { %29 = vsyncpa [#allocation8], 0 }
   0xc   :  { %30 = vsyncpa [#allocation11], 0 }
   0xd   :  { %31 = vsyncpa [#allocation14], 0  ;;  %s2675_s3 = smov [#allocation4]   ;;  %s2676_s29 = smov [#allocation7]  }
   0xe   :  { %s54_s28 = sshll.u32 %s2675_s3, 4  ;;  %s78_s30 = sshll.u32 %s2676_s29, 4  ;;  %s55_s28 = int_to_ptr.vmem [resolvable:$true] %s54_s28  ;;  %s79_s30 = int_to_ptr.vmem [resolvable:$true] %s78_s30 }
   0xf   :  { %s3705_s23 = sld [smem:[#allocation23_spill]] }
  0x15   :  { %s2489_s1 = scalar_lea.hbm %s3705_s23, 128 }
  0x16   :  { %p2490_p0 = scmp.ne.s32.totalorder %s3705_s23, %s2489_s1  ;;  %p2493_p1 = scmp.lt.u32.totalorder %s2489_s1, %s3705_s23 }
  0x18   :  { %p2495_p2 = pnand %p2493_p1, %p2490_p0 }
  0x1a   :  { %2498 = shalt.err (!%p2495_p2)
}
  0x1b   :  { %s2499_s26 = scalar_lea.vmem %s55_s28, 128  ;;  %p2504_p4 = scmp.lt.s32.totalorder %s55_s28, %s55_s28 }
  0x1c   :  { %p2500_p3 = scmp.ne.s32.totalorder %s55_s28, %s2499_s26  ;;  %p2505_p5 = scmp.lt.s32.totalorder %s2499_s26, %s2499_s26 }
  0x1e   :  { %p2506_p6 = por %p2505_p5, %p2504_p4 }
  0x20   :  { %p2507_p7 = pnand %p2506_p6, %p2500_p3 }
  0x22   :  { %2510 = shalt.err (!%p2507_p7)
}
  0x23   :  { %57 = dma.hbm_to_vmem [thread:$0]  %s3705_s23, 128, %s55_s28, [#allocation5]  }
  0x24   :  { %s2511_s4 = scalar_lea.hbm %s3677_s7, 128 }
  0x25   :  { %p2512_p8 = scmp.ne.s32.totalorder %s3677_s7, %s2511_s4  ;;  %p2515_p9 = scmp.lt.u32.totalorder %s2511_s4, %s3677_s7 }
  0x27   :  { %p2517_p10 = pnand %p2515_p9, %p2512_p8 }
  0x29   :  { %2520 = shalt.err (!%p2517_p10)
}
  0x2a   :  { %s2521_s6 = scalar_lea.vmem %s79_s30, 128  ;;  %p2526_p12 = scmp.lt.s32.totalorder %s79_s30, %s79_s30 }
  0x2b   :  { %p2522_p11 = scmp.ne.s32.totalorder %s79_s30, %s2521_s6  ;;  %p2527_p13 = scmp.lt.s32.totalorder %s2521_s6, %s2521_s6 }
  0x2d   :  { %p2528_p0 = por %p2527_p13, %p2526_p12 }
  0x2f   :  { %p2529_p1 = pnand %p2528_p0, %p2522_p11 }
  0x31   :  { %2532 = shalt.err (!%p2529_p1)
}
  0x32   :  { %81 = dma.hbm_to_vmem [thread:$0]  %s3677_s7, 128, %s79_s30, [#allocation8]  }
  0x33   :  { %s2677_s25 = smov [#allocation10]   ;;  %s2678_s2 = smov [#allocation2]  }
  0x34   :  { %s102_s26 = sshll.u32 %s2677_s25, 4  ;;  %s41_s27 = sshll.u32 %s2678_s2, 4  ;;  %s103_s26 = int_to_ptr.vmem [resolvable:$true] %s102_s26  ;;  %s2847_s27 = int_to_ptr.vmem [resolvable:$true] %s41_s27 }
  0x35   :  { %s2533_s4 = scalar_lea.hbm %s3681_s11, 32 }
  0x36   :  { %p2534_p2 = scmp.ne.s32.totalorder %s3681_s11, %s2533_s4  ;;  %p2537_p3 = scmp.lt.u32.totalorder %s2533_s4, %s3681_s11 }
  0x38   :  { %p2539_p4 = pnand %p2537_p3, %p2534_p2 }
  0x3a   :  { %2542 = shalt.err (!%p2539_p4)
}
  0x3b   :  { %s2543_s7 = scalar_lea.vmem %s103_s26, 32  ;;  %p2548_p6 = scmp.lt.s32.totalorder %s103_s26, %s103_s26 }
  0x3c   :  { %p2544_p5 = scmp.ne.s32.totalorder %s103_s26, %s2543_s7  ;;  %p2549_p7 = scmp.lt.s32.totalorder %s2543_s7, %s2543_s7 }
  0x3e   :  { %p2550_p8 = por %p2549_p7, %p2548_p6 }
  0x40   :  { %p2551_p9 = pnand %p2550_p8, %p2544_p5 }
  0x42   :  { %2554 = shalt.err (!%p2551_p9)
}
  0x43   :  { %105 = dma.hbm_to_vmem [thread:$0]  %s3681_s11, 32, %s103_s26, [#allocation11]  }
  0x44   :  { %s3706_s25 = sld [smem:[#allocation22_spill]] }
  0x4a   :  { %s2555_s2 = scalar_lea.hbm %s3706_s25, 256 }
  0x4b   :  { %p2556_p10 = scmp.ne.s32.totalorder %s3706_s25, %s2555_s2  ;;  %p2559_p11 = scmp.lt.u32.totalorder %s2555_s2, %s3706_s25 }
  0x4d   :  { %p2561_p12 = pnand %p2559_p11, %p2556_p10 }
  0x4f   :  { %2564 = shalt.err (!%p2561_p12)
}
  0x50   :  { %s2565_s5 = scalar_lea.vmem %s2847_s27, 256  ;;  %p2570_p0 = scmp.lt.s32.totalorder %s2847_s27, %s2847_s27 }
  0x51   :  { %p2566_p13 = scmp.ne.s32.totalorder %s2847_s27, %s2565_s5  ;;  %p2571_p1 = scmp.lt.s32.totalorder %s2565_s5, %s2565_s5 }
  0x53   :  { %p2572_p2 = por %p2571_p1, %p2570_p0 }
  0x55   :  { %p2573_p3 = pnand %p2572_p2, %p2566_p13 }
  0x57   :  { %2576 = shalt.err (!%p2573_p3)
}
  0x58   :  { %s2679_s11 = smov 128   ;;  %s2680_s26 = smov 8  }
  0x59   :  { %47 = dma.hbm_to_vmem [thread:$0]  %s3706_s25, 256, %s2847_s27, [#allocation3], %s2679_s11, %s2679_s11, %s2680_s26  }
  0x5a   :  { %s2681_s7 = smov [#allocation6]   ;;  %s2682_s6 = smov [#allocation9]  }
  0x5b   :  { %s68_s30 = sshll.u32 %s2681_s7, 4  ;;  %s92_s28 = sshll.u32 %s2682_s6, 4  ;;  %s69_s30 = int_to_ptr.vmem [resolvable:$true] %s68_s30  ;;  %s93_s28 = int_to_ptr.vmem [resolvable:$true] %s92_s28 }
  0x5c   :  { %s3707_s3 = sld [smem:[#allocation26_spill]] }
  0x62   :  { %s2577_s29 = scalar_lea.hbm %s3707_s3, 128 }
  0x63   :  { %p2578_p4 = scmp.ne.s32.totalorder %s3707_s3, %s2577_s29  ;;  %p2581_p5 = scmp.lt.u32.totalorder %s2577_s29, %s3707_s3 }
  0x65   :  { %p2583_p6 = pnand %p2581_p5, %p2578_p4 }
  0x67   :  { %2586 = shalt.err (!%p2583_p6)
}
  0x68   :  { %s2587_s27 = scalar_lea.vmem %s69_s30, 128  ;;  %p2592_p8 = scmp.lt.s32.totalorder %s69_s30, %s69_s30 }
  0x69   :  { %p2588_p7 = scmp.ne.s32.totalorder %s69_s30, %s2587_s27  ;;  %p2593_p9 = scmp.lt.s32.totalorder %s2587_s27, %s2587_s27 }
  0x6b   :  { %p2594_p10 = por %p2593_p9, %p2592_p8 }
  0x6d   :  { %p2595_p11 = pnand %p2594_p10, %p2588_p7 }
  0x6f   :  { %2598 = shalt.err (!%p2595_p11)
}
  0x70   :  { %71 = dma.hbm_to_vmem [thread:$0]  %s3707_s3, 128, %s69_s30, [#allocation5]  }
  0x71   :  { %s2599_s6 = scalar_lea.hbm %s3680_s10, 32 }
  0x72   :  { %p2600_p12 = scmp.ne.s32.totalorder %s3680_s10, %s2599_s6  ;;  %p2603_p13 = scmp.lt.u32.totalorder %s2599_s6, %s3680_s10 }
  0x74   :  { %p2605_p0 = pnand %p2603_p13, %p2600_p12 }
  0x76   :  { %2608 = shalt.err (!%p2605_p0)
}
  0x77   :  { %s2609_s4 = scalar_lea.vmem %s93_s28, 32  ;;  %p2614_p2 = scmp.lt.s32.totalorder %s93_s28, %s93_s28 }
  0x78   :  { %p2610_p1 = scmp.ne.s32.totalorder %s93_s28, %s2609_s4  ;;  %p2615_p3 = scmp.lt.s32.totalorder %s2609_s4, %s2609_s4 }
  0x7a   :  { %p2616_p4 = por %p2615_p3, %p2614_p2 }
  0x7c   :  { %p2617_p5 = pnand %p2616_p4, %p2610_p1 }
  0x7e   :  { %2620 = shalt.err (!%p2617_p5)
}
  0x7f   :  { %95 = dma.hbm_to_vmem [thread:$0]  %s3680_s10, 32, %s93_s28, [#allocation8]  }
  0x80   :  { %s2683_s0 = smov [#allocation12]   ;;  %s2684_s27 = smov [#allocation13]  }
  0x81   :  { %s124_s5 = sshll.u32 %s2683_s0, 4  ;;  %s133_s25 = sshll.u32 %s2684_s27, 4  ;;  %s125_s5 = int_to_ptr.vmem [resolvable:$true] %s124_s5  ;;  %s2905_s25 = int_to_ptr.vmem [resolvable:$true] %s133_s25 }
  0x82   :  { %s2621_s7 = scalar_lea.hbm %s3688_s18, 16 }
  0x83   :  { %p2622_p6 = scmp.ne.s32.totalorder %s3688_s18, %s2621_s7  ;;  %p2625_p7 = scmp.lt.u32.totalorder %s2621_s7, %s3688_s18 }
  0x85   :  { %p2627_p8 = pnand %p2625_p7, %p2622_p6 }
  0x87   :  { %2630 = shalt.err (!%p2627_p8)
}
  0x88   :  { %s2631_s10 = scalar_lea.vmem %s125_s5, 16  ;;  %s2635_s28 = scalar_lea.vmem %s125_s5, 32 }
  0x89   :  { %p2632_p9 = scmp.ne.s32.totalorder %s125_s5, %s2631_s10  ;;  %p2636_p10 = scmp.lt.s32.totalorder %s125_s5, %s125_s5 }
  0x8a   :  { %p2637_p11 = scmp.lt.s32.totalorder %s2635_s28, %s2631_s10 }
  0x8c   :  { %p2638_p12 = por %p2637_p11, %p2636_p10 }
  0x8e   :  { %p2639_p13 = pnand %p2638_p12, %p2632_p9 }
  0x90   :  { %2642 = shalt.err (!%p2639_p13)
}
  0x91   :  { %127 = dma.hbm_to_vmem [thread:$0]  %s3688_s18, 16, %s125_s5, [#allocation11]  }
  0x92   :  { %s2643_s0 = scalar_lea.hbm %s3689_s19, 256 }
  0x93   :  { %p2644_p0 = scmp.ne.s32.totalorder %s3689_s19, %s2643_s0  ;;  %p2647_p1 = scmp.lt.u32.totalorder %s2643_s0, %s3689_s19 }
  0x95   :  { %p2649_p2 = pnand %p2647_p1, %p2644_p0 }
  0x97   :  { %2652 = shalt.err (!%p2649_p2)
}
  0x98   :  { %s2653_s6 = scalar_lea.vmem %s2905_s25, 256  ;;  %p2658_p4 = scmp.lt.s32.totalorder %s2905_s25, %s2905_s25 }
  0x99   :  { %p2654_p3 = scmp.ne.s32.totalorder %s2905_s25, %s2653_s6  ;;  %p2659_p5 = scmp.lt.s32.totalorder %s2653_s6, %s2653_s6 }
  0x9b   :  { %p2660_p6 = por %p2659_p5, %p2658_p4 }
  0x9d   :  { %p2661_p7 = pnand %p2660_p6, %p2654_p3 }
  0x9f   :  { %2664 = shalt.err (!%p2661_p7)
}
  0xa0   :  { %139 = dma.hbm_to_vmem [thread:$0]  %s3689_s19, 256, %s2905_s25, [#allocation14], %s2679_s11, %s2679_s11, %s2680_s26  }
  0xa1   :  { %2665 = dma.done.wait [#allocation3], 256  }
  0xa2   :  { %2666 = vsyncadd [#allocation3], 4294967040 }
  0xa3   :  { %2667 = dma.done.wait [#allocation5], 256  }
  0xa4   :  { %2668 = vsyncadd [#allocation5], 4294967040 }
  0xa5   :  { %2669 = dma.done.wait [#allocation8], 160  }
  0xa6   :  { %2670 = vsyncadd [#allocation8], 4294967136 }
  0xa7   :  { %2671 = dma.done.wait [#allocation11], 48  }
  0xa8   :  { %2672 = vsyncadd [#allocation11], 4294967248 }
  0xa9   :  { %2673 = dma.done.wait [#allocation14], 256  }
  0xaa   :  { %2674 = vsyncadd [#allocation14], 4294967040  ;;  %v2685_v0 = vmov 0.0   ;;  %vm2686_vm0 = vmmov 0   ;;  %v2687_v1 = vmov 0   ;;  %vm179_vm1 = vcmask 64512  }
  0xab   :  { %2114 = vmatprep.subr.mxu0 %v2685_v0  ;;  %2116 = vmatprep.mubr.msk.f32.mxu0 %vm2686_vm0, %v2685_v0  ;;  %s3708_s26 = sld [smem:[#allocation20_spill]]  ;;  %v172_v3 = vld [vmem:[#allocation4] sm:$0xff]  ;;  %s3709_s22 = sld [smem:[#allocation24_spill]]  ;;  %v335_v6 = vld [vmem:[%s3678_s8] sm:$0x3f]  ;;  %v260_v14 = vld [vmem:[#allocation6] sm:$0xff]  ;;  %v843_v28 = vlaneseq }
  0xac   :  { %2476 = vset.pattern.permute.xlu0 %v2687_v1  ;;  %2477 = vset.pattern.permute.xlu1 %v2687_v1  ;;  %s3710_s28 = sld [smem:[#allocation25_spill]]  ;;  %v419_v7 = vld [vmem:[%s3679_s9] sm:$0x3f]  ;;  %s3711_s1 = sld [smem:[#allocation21_spill]]  ;;  %vm345_vm2 = vcmask 1045504   ;;  %vm341_vm3 = vcmask 48128  }
  0xad   :  { %2139 = vmatprep.subr.mxu1 %v2685_v0  ;;  %2141 = vmatprep.mubr.msk.f32.mxu1 %vm2686_vm0, %v2685_v0  ;;  %v334_v16 = vld [vmem:[#allocation7] sm:$0x3f]  ;;  %v2980_v21 = vld [vmem:[#allocation10] sm:$0x3]  ;;  %v426_v27 = vld [vmem:[#allocation9] sm:$0x3] }
  0xae   :  { %338 = vperm.xlu1 %2477, %v335_v6   ;;  %v2998_v29 = vshrl.u32 %v843_v28, 7  ;;  %v3000_v30 = vld [vmem:[#allocation2] sm:$0xff]  ;;  %s2688_s8 = smov 1   ;;  %s2689_s9 = smov 9   ;;  %vm671_vm6 = vcmask 1041408   ;;  %vm667_vm7 = vcmask 15360  }
  0xaf   :  { %v666_v57 = vld [vmem:[%s3682_s12] sm:$0xff]  ;;  %s2690_s6 = smov 11   ;;  %s2691_s18 = smov 19   ;;  %vm839_vm8 = vcmask 80896   ;;  %vm841_vm9 = vcmask 744448   ;;  %vm959_vm10 = vcmask 588800  }
  0xb0   :  { %v850_v31 = vsub.s32 1, %v2998_v29  ;;  %v868_v32 = vsub.s32 3, %v2998_v29  ;;  %v886_v58 = vsub.s32 5, %v2998_v29  ;;  %v904_v60 = vsub.s32 7, %v2998_v29  ;;  %s2692_s5 = smov 10   ;;  %s2693_s19 = smov 2  }
  0xb1   :  { %v168_v2 = vld [vmem:[%s3708_s26] sm:$0xff]  ;;  %v859_v62 = vsub.s32 2, %v2998_v29  ;;  %v895_v6 = vsub.s32 6, %v2998_v29  ;;  %s2694_s11 = smov 18   ;;  %s2695_s26 = smov 20   ;;  %vm817_vm11 = vcmask 658432  }
  0xb2   :  { %v173_v4 = vld [vmem:[%s3709_s22] sm:$0xff]  ;;  %2115 = vmatpush3.msra.mxu0 %v168_v2  ;;  %422 = vperm.xlu1 %2477, %v419_v7   ;;  %v851_v33 = vrot.slane %v3000_v30, %v850_v31  ;;  %v869_v34 = vrot.slane %v3000_v30, %v868_v32  ;;  %v887_v59 = vrot.slane %v3000_v30, %v886_v58  ;;  %s2697_s25 = smov 127   ;;  %s2698_s23 = smov 126   ;;  %vm825_vm12 = vcmask 662532  }
  0xb3   :  { %176 = vperm.xlu0 %2476, %v173_v4   ;;  %2117 = vmatmul.mubr.msk.f32.vlgmr.msra.gmra.mrb[0].mxu0 %vm179_vm1, %v172_v3  ;;  %v253_v5 = vld [vmem:[%s3710_s28] sm:$0xff]  ;;  %v905_v61 = vrot.slane %v3000_v30, %v904_v60  ;;  %v860_v3 = vrot.slane %v3000_v30, %v859_v62  ;;  %v877_v4 = vsub.s32 4, %v2998_v29  ;;  %v896_v7 = vrot.slane %v3000_v30, %v895_v6  ;;  %s2699_s22 = smov 119   ;;  %s2700_s2 = smov 118   ;;  %v1057_v60 = vld [vmem:[%s3685_s15 + $0x30] sm:$0xff]  ;;  %v1066_v6 = vld [vmem:[%s3685_s15 + $0x78] sm:$0xff] }
  0xb4   :  { %2119 = vmatprep.subr.mxu0 %v2685_v0  ;;  %2121 = vmatprep.mubr.msk.f32.mxu0 %vm2686_vm0, %v2685_v0  ;;  %v169_v15 = vld [vmem:[%s3711_s1] sm:$0x3f]  ;;  %s2701_s10 = smov 117   ;;  %s2702_s28 = smov 110   ;;  %vm833_vm13 = vcmask 1040384   ;;  %vm1047_vm14 = vcmask 277504  }
  0xb5   :  { %s2703_s29 = smov 109   ;;  %s2704_s3 = smov 108   ;;  %vm1049_vm15 = vcmask 941056  }
  0xb6   :  { %853 = vrot.lane.b32.xlu1 %v851_v33, %s2688_s8  ;;  %v953_v33 = vld [vmem:[%s3684_s14] sm:$0xf]  ;;  %s2705_s24 = smov 81   ;;  %s2706_s7 = smov 34  }
  0xb7   :  { %256 = vperm.xlu0 %2476, %v253_v5   ;;  %v878_v5 = vrot.slane %v3000_v30, %v877_v4 }
  0xba   :  { %871 = vrot.lane.b32.xlu1 %v869_v34, %s2689_s9  ;;  %v845_v34 = vsub.s32 0, %v2998_v29 }
  0xbe   :  { %889 = vrot.lane.b32.xlu1 %v887_v59, %s2690_s6 }
  0xc2   :  { %907 = vrot.lane.b32.xlu1 %v905_v61, %s2691_s18  ;;  %v1060_v61 = vld [vmem:[%s3685_s15 + $0x48] sm:$0xff] }
 0x12d   :  { %v339_v17 = vpop.permute.xlu1 %338 }
 0x131   :  { %v423_v23 = vpop.permute.xlu1 %422 }
 0x132   :  { %v177_v8 = vpop.permute.xlu0 %176 }
 0x136   :  { %v257_v12 = vpop.permute.xlu0 %256 }
 0x186   :  { %v249_v9 = vpop.f32.mrb[0].mxu0 }
 0x187   :  { %v250_v10 = vadd.f32 %v249_v9, %v177_v8  ;;  %v2118_v11 = vpop.f32.mrb[1].mxu0  ;;  %v1971_v8 = vld [vmem:[#allocation2 + $0x8] ss:$0 sm:$0xff]  ;;  %v2696_v9 = vmov 0.0|0.0  }
 0x189   :  { %v259_v13 = vmul.f32 %v257_v12, %v250_v10  ;;  %v3037_v10 = vpop.permute.xlu1 %853 }
 0x18b   :  { %2120 = vmatpush3.msra.mxu0 %v259_v13 }
 0x18c   :  { %2122 = vmatmul.mubr.msk.f32.vlgmr.msra.gmra.mrb[2].mxu0 %vm179_vm1, %v260_v14  ;;  %2124 = vmatprep.subr.mxu0 %v2685_v0 }
 0x18d   :  { %2125 = vmatpush3.msk.msra.mxu0 %vm345_vm2, %v169_v15  ;;  %2126 = vmatprep.mubr.msk.f32.mxu0 %vm2686_vm0, %v2685_v0  ;;  %v3039_v11 = vpop.permute.xlu1 %871 }
 0x18e   :  { %2129 = vmatprep.subr.mxu0 %v2685_v0 }
 0x190   :  { %2127 = vmatmul.mubr.msk.f32.vlgmr.msra.gmra.mrb[4].mxu0 %vm341_vm3, %v334_v16 }
 0x191   :  { %2131 = vmatprep.mubr.msk.f32.mxu0 %vm2686_vm0, %v2685_v0 }
 0x25f   :  { %v2976_v18 = vpop.f32.mrb[2].mxu0 }
 0x260   :  { %v2123_v19 = vpop.f32.mrb[3].mxu0  ;;  %v577_v20 = vmul.f32 %v2976_v18, %v2976_v18 }
 0x261   :  { %v3048_v19 = vpop.permute.xlu1 %889 }
 0x262   :  { %2140 = vmatpush3.msra.mxu1 %v577_v20 }
 0x263   :  { %v415_v22 = vpop.f32.mrb[4].mxu0  ;;  %2142 = vmatmul.mubr.msk.f32.vlgmr.msra.gmra.mrb[0].mxu1 %vm179_vm1, %v2980_v21  ;;  %2149 = vmatprep.subr.mxu1 %v2685_v0 }
 0x264   :  { %v416_v24 = vadd.f32 %v415_v22, %v339_v17  ;;  %v2128_v25 = vpop.f32.mrb[5].mxu0  ;;  %2151 = vmatprep.mubr.msk.f32.mxu1 %vm2686_vm0, %v2685_v0 }
 0x266   :  { %v425_v26 = vmul.f32 %v423_v23, %v416_v24  ;;  %v3058_v24 = vpop.permute.xlu1 %907 }
 0x268   :  { %2130 = vmatpush3.msk.msra.mxu0 %vm345_vm2, %v425_v26  ;;  %vm1194_vm2 = vcmask 1043456  }
 0x269   :  { %2134 = vmatprep.subr.mxu0 %v2685_v0  ;;  %2132 = vmatmul.mubr.msk.f32.vlgmr.msra.gmra.mrb[6].mxu0 %vm341_vm3, %v426_v27  ;;  %vm1191_vm3 = vcmask 556032  }
 0x26a   :  { %2135 = vmatpush3.msra.mxu0 %v2976_v18  ;;  %2136 = vmatprep.mubr.msk.f32.mxu0 %vm2686_vm0, %v2685_v0 }
 0x26b   :  { %2144 = vmatprep.subr.mxu0 %v2685_v0 }
 0x26d   :  { %2137 = vmatmul.mubr.msk.f32.vlgmr.msra.gmra.mrb[8].mxu0 %vm179_vm1, %v2980_v21 }
 0x26e   :  { %2146 = vmatprep.mubr.msk.f32.mxu0 %vm2686_vm0, %v2685_v0 }
 0x336   :  { %v644_v35 = vpop.f32.mrb[0].mxu1 }
 0x337   :  { %2478 = vrsqrt.f32 %v644_v35  ;;  %v2143_v36 = vpop.f32.mrb[1].mxu1  ;;  %vm650_vm4 = vcmp.eq.f32.partialorder %v644_v35, inf  ;;  %v653_v46 = vand.u32 2147483648, %v644_v35  ;;  %vm652_vm5 = vcmp.eq.f32.partialorder %v644_v35, 0.0 }
 0x33c   :  { %v499_v37 = vpop.f32.mrb[6].mxu0 }
 0x33d   :  { %v655_v38 = vand.u32 2147483647, %v499_v37  ;;  %v2133_v39 = vpop.f32.mrb[7].mxu0 }
 0x33f   :  { %v656_v40 = vmul.f32 2.0, %v655_v38 }
 0x340   :  { %v573_v41 = vpop.f32.mrb[8].mxu0 }
 0x341   :  { %v2479_v42 = vpop.eup %2478  ;;  %v657_v43 = vmul.f32 %v573_v41, %v499_v37  ;;  %v2138_v44 = vpop.f32.mrb[9].mxu0  ;;  %v659_v48 = vmax.f32 %v656_v40, 1e-08 }
 0x342   :  { %v649_v45 = vmul.f32 %v2479_v42, %v644_v35 }
 0x344   :  { %v651_v47 = vsel %vm650_vm4, %v644_v35, %v649_v45  ;;  %v3078_v35 = vrot.slane %v3000_v30, %v845_v34 }
 0x345   :  { %v654_v49 = vsel %vm652_vm5, %v653_v46, %v651_v47  ;;  %v952_v47 = vld [vmem:[%s3683_s13] sm:$0xf]  ;;  %s2707_s13 = smov 115  }
 0x346   :  { %v658_v50 = vmax.f32 %v654_v49, 1e-08  ;;  %v1052_v49 = vld [vmem:[%s3685_s15 + $0x8] sm:$0xff] }
 0x348   :  { %v660_v51 = vmul.f32 %v659_v48, %v658_v50  ;;  %v1055_v50 = vld [vmem:[%s3685_s15 + $0x20] sm:$0xff] }
 0x34a   :  { %2480 = vrcp.f32 %v660_v51  ;;  %v1051_v51 = vld [vmem:[%s3685_s15] sm:$0xff] }
 0x354   :  { %v2481_v52 = vpop.eup %2480 }
 0x355   :  { %v662_v53 = vmul.f32 %v2481_v52, %v657_v43 }
 0x357   :  { %v663_v54 = vsub.f32 1.0, %v662_v53  ;;  %v2255_v53 = vpack.c.bf16 %v1055_v50, %v1052_v49  ;;  %v1113_v49 = vld [vmem:[%s3685_s15 + $0x1f0] sm:$0xff] }
 0x359   :  { %v664_v55 = vmul.f32 0.5, %v663_v54  ;;  %v1054_v54 = vld [vmem:[%s3685_s15 + $0x18] sm:$0xff] }
 0x35a   :  { %v2257_v58 = vpack.c.bf16 %v1054_v54, %v1051_v51  ;;  %v1084_v51 = vld [vmem:[%s3685_s15 + $0x108] sm:$0xff] }
 0x35b   :  { %v665_v56 = vmul.f32 %v664_v55, %v499_v37  ;;  %v1058_v55 = vld [vmem:[%s3685_s15 + $0x38] sm:$0xff]  ;;  %v1116_v54 = vld [vmem:[%s3685_s15 + $0x208] sm:$0xff] }
 0x35d   :  { %2145 = vmatpush3.msk.msra.mxu0 %vm671_vm6, %v665_v56  ;;  %v1061_v56 = vld [vmem:[%s3685_s15 + $0x50] sm:$0xff] }
 0x35e   :  { %2147 = vmatmul.mubr.msk.f32.vlgmr.msra.gmra.mrb[10].mxu0 %vm667_vm7, %v666_v57  ;;  %2243 = vmatprep.subr.bf16.mxu0 %v2696_v9  ;;  %v2259_v59 = vpack.c.bf16 %v1061_v56, %v1058_v55  ;;  %v1091_v55 = vld [vmem:[%s3685_s15 + $0x140] sm:$0xff]  ;;  %v2343_v56 = vpack.c.bf16 %v1116_v54, %v1113_v49  ;;  %v1140_v49 = vld [vmem:[%s3685_s15 + $0x2c8] sm:$0xff] }
 0x35f   :  { %2172 = vmatprep.mubr.msk.f32.mxu0 %vm2686_vm0, %v2685_v0 }
 0x431   :  { %v741_v63 = vpop.f32.mrb[10].mxu0 }
 0x432   :  { %v3021_v1 = vadd.f32 %v741_v63, %v2976_v18  ;;  %v2148_v2 = vpop.f32.mrb[11].mxu0  ;;  %v1064_v63 = vld [vmem:[%s3685_s15 + $0x68] sm:$0xff] }
 0x433   :  { %v1067_v2 = vld [vmem:[%s3685_s15 + $0x80] sm:$0xff] }
 0x434   :  { %836 = vrot.lane.b32.xlu0 %v3021_v1, %s2692_s5  ;;  %2150 = vmatpush3.msra.mxu1 %v3021_v1  ;;  %v2263_v4 = vpack.c.bf16 %v1067_v2, %v1064_v63  ;;  %v1087_v63 = vld [vmem:[%s3685_s15 + $0x120] sm:$0xff]  ;;  %v1090_v2 = vld [vmem:[%s3685_s15 + $0x138] sm:$0xff] }
 0x435   :  { %2152 = vmatmul.mubr.msk.f32.vlgmr.msra.gmra.mrb[2].mxu1 %vm179_vm1, %v2980_v21  ;;  %2256 = vmatprep.subr.bf16.mxu1 %v2255_v53  ;;  %v1088_v53 = vld [vmem:[%s3685_s15 + $0x128] sm:$0xff]  ;;  %vm1045_vm1 = vcmask 662528  }
 0x436   :  { %2258 = vmatpush1.bf16.msra.mxu1 %v2257_v58  ;;  %v1068_v58 = vld [vmem:[%s3685_s15 + $0x88] sm:$0xff] }
 0x437   :  { %2260 = vmatprep.subr.bf16.mxu1 %v2259_v59  ;;  %v1119_v59 = vld [vmem:[%s3685_s15 + $0x220] sm:$0xff] }
 0x438   :  { %862 = vrot.lane.b32.xlu0 %v860_v3, %s2693_s19  ;;  %v2261_v3 = vpack.c.bf16 %v1060_v61, %v1057_v60  ;;  %v1122_v60 = vld [vmem:[%s3685_s15 + $0x238] sm:$0xff] }
 0x43a   :  { %2262 = vmatpush1.bf16.msra.mxu1 %v2261_v3 }
 0x43b   :  { %2264 = vmatprep.subr.bf16.mxu1 %v2263_v4  ;;  %v2279_v4 = vpack.c.bf16 %v1091_v55, %v1088_v53  ;;  %v1108_v55 = vld [vmem:[%s3685_s15 + $0x1c8] sm:$0xff] }
 0x43c   :  { %880 = vrot.lane.b32.xlu0 %v878_v5, %s2692_s5  ;;  %v1063_v5 = vld [vmem:[%s3685_s15 + $0x60] sm:$0xff] }
 0x440   :  { %898 = vrot.lane.b32.xlu0 %v896_v7, %s2694_s11  ;;  %v1070_v7 = vld [vmem:[%s3685_s15 + $0x98] sm:$0xff] }
 0x444   :  { %916 = vrot.lane.b32.xlu0 %v1971_v8, %s2695_s26  ;;  %v1073_v8 = vld [vmem:[%s3685_s15 + $0xb0] sm:$0xff] }
 0x4a6   :  { %v837_v12 = vpop.permute.xlu0 %836 }
 0x4a7   :  { %v840_v13 = vsel %vm839_vm8, 0.0, %v837_v12  ;;  %v2265_v12 = vpack.c.bf16 %v1066_v6, %v1063_v5  ;;  %v1094_v5 = vld [vmem:[%s3685_s15 + $0x158] sm:$0xff]  ;;  %v2347_v6 = vpack.c.bf16 %v1122_v60, %v1119_v59  ;;  %v1112_v59 = vld [vmem:[%s3685_s15 + $0x1e8] sm:$0xff]  ;;  %v1115_v60 = vld [vmem:[%s3685_s15 + $0x200] sm:$0xff] }
 0x4a8   :  { %v842_v14 = vsel %vm841_vm9, %v840_v13, 0.0  ;;  %v2267_v13 = vpack.c.bf16 %v1073_v8, %v1070_v7  ;;  %v1071_v7 = vld [vmem:[%s3685_s15 + $0xa0] sm:$0xff]  ;;  %v1074_v8 = vld [vmem:[%s3685_s15 + $0xb8] sm:$0xff] }
 0x4a9   :  { %v856_v15 = vmul.f32 %v3037_v10, %v842_v14  ;;  %v874_v20 = vmul.f32 %v3039_v11, %v842_v14  ;;  %v892_v23 = vmul.f32 %v3048_v19, %v842_v14  ;;  %v910_v27 = vmul.f32 %v3058_v24, %v842_v14  ;;  %2266 = vmatpush1.bf16.msra.mxu1 %v2265_v12  ;;  %v1097_v12 = vld [vmem:[%s3685_s15 + $0x170] sm:$0xff] }
 0x4aa   :  { %v3044_v16 = vpop.permute.xlu0 %862  ;;  %v847_v36 = vmul.f32 %v3078_v35, %v842_v14  ;;  %2268 = vmatprep.subr.bf16.mxu1 %v2267_v13  ;;  %v1125_v13 = vld [vmem:[%s3685_s15 + $0x250] sm:$0xff] }
 0x4ab   :  { %v865_v17 = vmul.f32 %v3044_v16, %v842_v14  ;;  %921 = vrot.lane.b32.xlu1 %v856_v15, %s2697_s25  ;;  %v1072_v15 = vld [vmem:[%s3685_s15 + $0xa8] sm:$0xff] }
 0x4ad   :  { %925 = vrot.lane.b32.xlu0 %v865_v17, %s2698_s23  ;;  %v1076_v17 = vld [vmem:[%s3685_s15 + $0xc8] sm:$0xff] }
 0x4ae   :  { %v3052_v21 = vpop.permute.xlu0 %880 }
 0x4af   :  { %v883_v22 = vmul.f32 %v3052_v21, %v842_v14  ;;  %929 = vrot.lane.b32.xlu1 %v874_v20, %s2699_s22  ;;  %v1079_v20 = vld [vmem:[%s3685_s15 + $0xe0] sm:$0xff] }
 0x4b1   :  { %933 = vrot.lane.b32.xlu0 %v883_v22, %s2700_s2  ;;  %v1101_v22 = vld [vmem:[%s3685_s15 + $0x190] sm:$0xff] }
 0x4b2   :  { %v3060_v25 = vpop.permute.xlu0 %898 }
 0x4b3   :  { %v901_v26 = vmul.f32 %v3060_v25, %v842_v14  ;;  %937 = vrot.lane.b32.xlu1 %v892_v23, %s2701_s10  ;;  %v1104_v23 = vld [vmem:[%s3685_s15 + $0x1a8] sm:$0xff] }
 0x4b5   :  { %941 = vrot.lane.b32.xlu0 %v901_v26, %s2702_s28 }
 0x4b6   :  { %v3066_v28 = vpop.permute.xlu0 %916 }
 0x4b7   :  { %v919_v32 = vmul.f32 %v3066_v28, %v842_v14  ;;  %945 = vrot.lane.b32.xlu1 %v910_v27, %s2703_s29  ;;  %v1069_v14 = vld [vmem:[%s3685_s15 + $0x90] sm:$0xff]  ;;  %v1075_v27 = vld [vmem:[%s3685_s15 + $0xc0] sm:$0xff] }
 0x4b8   :  { %v2269_v26 = vpack.c.bf16 %v1072_v15, %v1069_v14  ;;  %v1128_v14 = vld [vmem:[%s3685_s15 + $0x268] sm:$0xff]  ;;  %v2281_v15 = vpack.c.bf16 %v1090_v2, %v1087_v63  ;;  %v2295_v2 = vpack.c.bf16 %v1115_v60, %v1112_v59 }
 0x4b9   :  { %949 = vrot.lane.b32.xlu0 %v919_v32, %s2704_s3  ;;  %v2335_v32 = vpack.c.bf16 %v1104_v23, %v1101_v22  ;;  %v2349_v22 = vpack.c.bf16 %v1074_v8, %v1071_v7  ;;  %v2283_v23 = vpack.c.bf16 %v1097_v12, %v1094_v5  ;;  %v1118_v5 = vld [vmem:[%s3685_s15 + $0x218] sm:$0xff]  ;;  %v1117_v12 = vld [vmem:[%s3685_s15 + $0x210] sm:$0xff]  ;;  %v1144_v59 = vld [vmem:[%s3685_s15 + $0x2e8] sm:$0xff] }
 0x4ba   :  { %2270 = vmatpush1.bf16.msra.mxu1 %v2269_v26  ;;  %v1100_v26 = vld [vmem:[%s3685_s15 + $0x188] sm:$0xff] }
 0x4bb   :  { %956 = vperm.xlu1 %2477, %v953_v33   ;;  %v1053_v33 = vld [vmem:[%s3685_s15 + $0x10] sm:$0xff] }
 0x508   :  { %v3098_v52 = vpop.f32.mrb[2].mxu1 }
 0x509   :  { %v2153_v57 = vpop.f32.mrb[3].mxu1 }
 0x50a   :  { %v1065_v57 = vld [vmem:[%s3685_s15 + $0x70] sm:$0xff] }
 0x50b   :  { %v2345_v3 = vpack.c.bf16 %v1068_v58, %v1065_v57  ;;  %v1089_v57 = vld [vmem:[%s3685_s15 + $0x130] sm:$0xff]  ;;  %v1092_v58 = vld [vmem:[%s3685_s15 + $0x148] sm:$0xff] }
 0x50c   :  { %v2361_v63 = vpack.c.bf16 %v1092_v58, %v1089_v57  ;;  %v1146_v57 = vld [vmem:[%s3685_s15 + $0x2f8] sm:$0xff]  ;;  %v1141_v58 = vld [vmem:[%s3685_s15 + $0x2d0] sm:$0xff] }
 0x51d   :  { %v922_v37 = vpop.permute.xlu1 %921 }
 0x51e   :  { %v2244_v38 = vpack.c.bf16 %v922_v37, %v847_v36  ;;  %v2271_v36 = vpack.c.bf16 %v1079_v20, %v1076_v17  ;;  %v1078_v37 = vld [vmem:[%s3685_s15 + $0xd8] sm:$0xff]  ;;  %v1093_v17 = vld [vmem:[%s3685_s15 + $0x150] sm:$0xff]  ;;  %v1096_v20 = vld [vmem:[%s3685_s15 + $0x168] sm:$0xff] }
 0x51f   :  { %v926_v39 = vpop.permute.xlu0 %925 }
 0x520   :  { %2245 = vmatpush3.bf16.msra.mxu0 %v2244_v38  ;;  %v1082_v38 = vld [vmem:[%s3685_s15 + $0xf8] sm:$0xff]  ;;  %2272 = vmatprep.subr.bf16.mxu1 %v2271_v36  ;;  %v1103_v36 = vld [vmem:[%s3685_s15 + $0x1a0] sm:$0xff] }
 0x521   :  { %v930_v40 = vpop.permute.xlu1 %929  ;;  %2246 = vmatprep.subr.bf16.mxu0 %v2696_v9 }
 0x522   :  { %v2247_v41 = vpack.c.bf16 %v930_v40, %v926_v39  ;;  %v1056_v39 = vld [vmem:[%s3685_s15 + $0x28] sm:$0xff]  ;;  %v1085_v40 = vld [vmem:[%s3685_s15 + $0x110] sm:$0xff] }
 0x523   :  { %v934_v42 = vpop.permute.xlu0 %933  ;;  %v2275_v50 = vpack.c.bf16 %v1085_v40, %v1082_v38  ;;  %v1134_v38 = vld [vmem:[%s3685_s15 + $0x298] sm:$0xff]  ;;  %v1099_v40 = vld [vmem:[%s3685_s15 + $0x180] sm:$0xff] }
 0x524   :  { %2248 = vmatpush3.bf16.msra.mxu0 %v2247_v41  ;;  %v2337_v41 = vpack.c.bf16 %v1056_v39, %v1053_v33  ;;  %v1080_v33 = vld [vmem:[%s3685_s15 + $0xe8] sm:$0xff]  ;;  %v2285_v39 = vpack.c.bf16 %v1096_v20, %v1093_v17 }
 0x525   :  { %v938_v43 = vpop.permute.xlu1 %937  ;;  %2249 = vmatprep.subr.bf16.mxu0 %v2696_v9 }
 0x526   :  { %v2250_v44 = vpack.c.bf16 %v938_v43, %v934_v42  ;;  %v1107_v42 = vld [vmem:[%s3685_s15 + $0x1c0] sm:$0xff]  ;;  %v1110_v43 = vld [vmem:[%s3685_s15 + $0x1d8] sm:$0xff] }
 0x527   :  { %v942_v45 = vpop.permute.xlu0 %941 }
 0x528   :  { %2251 = vmatpush3.bf16.msra.mxu0 %v2250_v44  ;;  %v2339_v44 = vpack.c.bf16 %v1110_v43, %v1107_v42  ;;  %v2287_v43 = vpack.c.bf16 %v1103_v36, %v1100_v26  ;;  %v1130_v26 = vld [vmem:[%s3685_s15 + $0x278] sm:$0xff]  ;;  %v1129_v36 = vld [vmem:[%s3685_s15 + $0x270] sm:$0xff] }
 0x529   :  { %v946_v30 = vpop.permute.xlu1 %945  ;;  %2252 = vmatprep.subr.bf16.mxu0 %v2696_v9 }
 0x52a   :  { %v2253_v46 = vpack.c.bf16 %v946_v30, %v942_v45  ;;  %v1059_v45 = vld [vmem:[%s3685_s15 + $0x40] sm:$0xff]  ;;  %v1062_v30 = vld [vmem:[%s3685_s15 + $0x58] sm:$0xff] }
 0x52b   :  { %v950_v48 = vpop.permute.xlu0 %949 }
 0x52c   :  { %2254 = vmatpush3.bf16.msra.mxu0 %v2253_v46  ;;  %v2273_v46 = vpack.c.bf16 %v1078_v37, %v1075_v27  ;;  %v2351_v27 = vpack.c.bf16 %v1128_v14, %v1125_v13  ;;  %v1131_v37 = vld [vmem:[%s3685_s15 + $0x280] sm:$0xff]  ;;  %v1120_v13 = vld [vmem:[%s3685_s15 + $0x228] sm:$0xff] }
 0x52d   :  { %2170 = vmatprep.subr.mxu0 %v2685_v0  ;;  %v1124_v14 = vld [vmem:[%s3685_s15 + $0x248] sm:$0xff]  ;;  %v2301_v17 = vpack.c.bf16 %v1120_v13, %v1117_v12 }
 0x52e   :  { %2274 = vmatpush1.bf16.msra.mxu1 %v2273_v46  ;;  %v1086_v46 = vld [vmem:[%s3685_s15 + $0x118] sm:$0xff] }
 0x52f   :  { %2276 = vmatprep.subr.bf16.mxu1 %v2275_v50 }
 0x530   :  { %2171 = vmatpush3.msra.mxu0 %v950_v48  ;;  %v2341_v48 = vpack.c.bf16 %v1062_v30, %v1059_v45  ;;  %v2355_v45 = vpack.c.bf16 %v1134_v38, %v1131_v37  ;;  %v1083_v30 = vld [vmem:[%s3685_s15 + $0x100] sm:$0xff]  ;;  %v1132_v37 = vld [vmem:[%s3685_s15 + $0x288] sm:$0xff] }
 0x531   :  { %2173 = vmatmul.mubr.msk.f32.vlgmr.msra.gmra.mrb[12].mxu0 %vm959_vm10, %v952_v47  ;;  %2336 = vmatprep.subr.bf16.mxu0 %v2335_v32  ;;  %v1081_v47 = vld [vmem:[%s3685_s15 + $0xf0] sm:$0xff]  ;;  %v2357_v53 = vpack.c.bf16 %v1086_v46, %v1083_v30  ;;  %v1136_v38 = vld [vmem:[%s3685_s15 + $0x2a8] sm:$0xff]  ;;  %v826_v30 = vsel %vm825_vm12, %v3021_v1, -inf }
 0x532   :  { %2338 = vmatpush3.bf16.msra.mxu0 %v2337_v41  ;;  %v2277_v61 = vpack.c.bf16 %v1084_v51, %v1081_v47  ;;  %v1077_v32 = vld [vmem:[%s3685_s15 + $0xd0] sm:$0xff]  ;;  %v1102_v41 = vld [vmem:[%s3685_s15 + $0x198] sm:$0xff] }
 0x533   :  { %2340 = vmatprep.subr.bf16.mxu0 %v2339_v44  ;;  %v2353_v42 = vpack.c.bf16 %v1080_v33, %v1077_v32  ;;  %v1106_v44 = vld [vmem:[%s3685_s15 + $0x1b8] sm:$0xff]  ;;  %v1109_v47 = vld [vmem:[%s3685_s15 + $0x1d0] sm:$0xff]  ;;  %v2289_v50 = vpack.c.bf16 %v1102_v41, %v1099_v40  ;;  %v2309_v40 = vpack.c.bf16 %v1132_v37, %v1129_v36 }
 0x534   :  { %2278 = vmatpush1.bf16.msra.mxu1 %v2277_v61  ;;  %v1105_v51 = vld [vmem:[%s3685_s15 + $0x1b0] sm:$0xff]  ;;  %v2291_v54 = vpack.c.bf16 %v1109_v47, %v1106_v44  ;;  %v827_v47 = vrot.slane %v826_v30, 4  ;;  %v1150_v36 = vld [vmem:[%s3685_s15 + $0x318] sm:$0xff] }
 0x535   :  { %2280 = vmatprep.subr.bf16.mxu1 %v2279_v4  ;;  %v2293_v61 = vpack.c.bf16 %v1108_v55, %v1105_v51  ;;  %v1114_v4 = vld [vmem:[%s3685_s15 + $0x1f8] sm:$0xff]  ;;  %v1145_v51 = vld [vmem:[%s3685_s15 + $0x2f0] sm:$0xff] }
 0x536   :  { %2342 = vmatpush3.bf16.msra.mxu0 %v2341_v48  ;;  %v1137_v48 = vld [vmem:[%s3685_s15 + $0x2b0] sm:$0xff] }
 0x537   :  { %2344 = vmatprep.subr.bf16.mxu0 %v2343_v56  ;;  %v2359_v56 = vpack.c.bf16 %v1140_v49, %v1137_v48  ;;  %v828_v49 = vmax.f32 %v826_v30, %v827_v47  ;;  %v1149_v37 = vld [vmem:[%s3685_s15 + $0x310] sm:$0xff] }
 0x538   :  { %2282 = vmatpush1.bf16.msra.mxu1 %v2281_v15  ;;  %v1127_v15 = vld [vmem:[%s3685_s15 + $0x260] sm:$0xff] }
 0x539   :  { %2284 = vmatprep.subr.bf16.mxu1 %v2283_v23  ;;  %v2303_v20 = vpack.c.bf16 %v1127_v15, %v1124_v14  ;;  %v1126_v23 = vld [vmem:[%s3685_s15 + $0x258] sm:$0xff]  ;;  %v829_v55 = vrot.slane %v828_v49, 2 }
 0x53a   :  { %2346 = vmatpush3.bf16.msra.mxu0 %v2345_v3  ;;  %v1111_v3 = vld [vmem:[%s3685_s15 + $0x1e0] sm:$0xff]  ;;  %v957_v14 = vpop.permute.xlu1 %956 }
 0x53b   :  { %2348 = vmatprep.subr.bf16.mxu0 %v2347_v6  ;;  %v1121_v6 = vld [vmem:[%s3685_s15 + $0x230] sm:$0xff]  ;;  %v2297_v7 = vpack.c.bf16 %v1114_v4, %v1111_v3  ;;  %v1148_v4 = vld [vmem:[%s3685_s15 + $0x308] sm:$0xff] }
 0x53c   :  { %2286 = vmatpush1.bf16.msra.mxu1 %v2285_v39  ;;  %v2299_v8 = vpack.c.bf16 %v1121_v6, %v1118_v5  ;;  %v1139_v39 = vld [vmem:[%s3685_s15 + $0x2c0] sm:$0xff] }
 0x53d   :  { %2288 = vmatprep.subr.bf16.mxu1 %v2287_v43  ;;  %v2311_v41 = vpack.c.bf16 %v1139_v39, %v1136_v38  ;;  %v1138_v43 = vld [vmem:[%s3685_s15 + $0x2b8] sm:$0xff]  ;;  %v1151_v5 = vld [vmem:[%s3685_s15 + $0x320] sm:$0xff]  ;;  %v1152_v38 = vld [vmem:[%s3685_s15 + $0x328] sm:$0xff]  ;;  %v816_v39 = vmul.f32 0.25, %v3098_v52 }
 0x53e   :  { %2350 = vmatpush3.bf16.msra.mxu0 %v2349_v22  ;;  %v1123_v22 = vld [vmem:[%s3685_s15 + $0x240] sm:$0xff]  ;;  %v2368_v30 = vpack.c.bf16 %v1152_v38, %v1149_v37  ;;  %v1532_v37 = vld [vmem:[%s3687_s17 + $0x98] sm:$0xff] }
 0x53f   :  { %2352 = vmatprep.subr.bf16.mxu0 %v2351_v27  ;;  %v1133_v27 = vld [vmem:[%s3685_s15 + $0x290] sm:$0xff]  ;;  %v2305_v32 = vpack.c.bf16 %v1126_v23, %v1123_v22 }
 0x540   :  { %2290 = vmatpush1.bf16.msra.mxu1 %v2289_v50  ;;  %v2307_v33 = vpack.c.bf16 %v1133_v27, %v1130_v26  ;;  %v1142_v50 = vld [vmem:[%s3685_s15 + $0x2d8] sm:$0xff] }
 0x541   :  { %2292 = vmatprep.subr.bf16.mxu1 %v2291_v54 }
 0x542   :  { %2354 = vmatpush3.bf16.msra.mxu0 %v2353_v42  ;;  %v1135_v42 = vld [vmem:[%s3685_s15 + $0x2a0] sm:$0xff] }
 0x543   :  { %2356 = vmatprep.subr.bf16.mxu0 %v2355_v45  ;;  %v2313_v44 = vpack.c.bf16 %v1138_v43, %v1135_v42  ;;  %v818_v45 = vsel %vm817_vm11, %v3021_v1, -inf  ;;  %v1157_v42 = vld [vmem:[%s3685_s15 + $0x350] sm:$0xff] }
 0x544   :  { %2294 = vmatpush1.bf16.msra.mxu1 %v2293_v61  ;;  %v819_v46 = vrot.slane %v818_v45, 4  ;;  %v2317_v61 = vpack.c.bf16 %v1144_v59, %v1141_v58  ;;  %v1162_v59 = vld [vmem:[%s3685_s15 + $0x378] sm:$0xff] }
 0x545   :  { %2296 = vmatprep.subr.bf16.mxu1 %v2295_v2  ;;  %v1098_v2 = vld [vmem:[%s3685_s15 + $0x178] sm:$0xff] }
 0x546   :  { %2358 = vmatpush3.bf16.msra.mxu0 %v2357_v53  ;;  %v820_v48 = vmax.f32 %v818_v45, %v819_v46  ;;  %v1143_v53 = vld [vmem:[%s3685_s15 + $0x2e0] sm:$0xff]  ;;  %v1153_v46 = vld [vmem:[%s3685_s15 + $0x330] sm:$0xff] }
 0x547   :  { %2360 = vmatprep.subr.bf16.mxu0 %v2359_v56  ;;  %v2315_v56 = vpack.c.bf16 %v1145_v51, %v1142_v50  ;;  %v2363_v60 = vpack.c.bf16 %v1146_v57, %v1143_v53  ;;  %v1158_v50 = vld [vmem:[%s3685_s15 + $0x358] sm:$0xff]  ;;  %v1160_v53 = vld [vmem:[%s3685_s15 + $0x368] sm:$0xff]  ;;  %v1159_v57 = vld [vmem:[%s3685_s15 + $0x360] sm:$0xff] }
 0x548   :  { %2298 = vmatpush1.bf16.msra.mxu1 %v2297_v7  ;;  %v821_v54 = vrot.slane %v820_v48, 2  ;;  %v830_v7 = vmax.f32 %v828_v49, %v829_v55  ;;  %v1155_v49 = vld [vmem:[%s3685_s15 + $0x340] sm:$0xff] }
 0x549   :  { %2300 = vmatprep.subr.bf16.mxu1 %v2299_v8  ;;  %v2319_v8 = vpack.c.bf16 %v1151_v5, %v1148_v4  ;;  %v1165_v5 = vld [vmem:[%s3685_s15 + $0x390] sm:$0xff] }
 0x54a   :  { %2362 = vmatpush3.bf16.msra.mxu0 %v2361_v63  ;;  %v1095_v63 = vld [vmem:[%s3685_s15 + $0x160] sm:$0xff]  ;;  %v822_v6 = vmax.f32 %v820_v48, %v821_v54  ;;  %v831_v13 = vrot.slane %v830_v7, 1  ;;  %v1156_v48 = vld [vmem:[%s3685_s15 + $0x348] sm:$0xff] }
 0x54b   :  { %v2365_v3 = vpack.c.bf16 %v1098_v2, %v1095_v63  ;;  %2364 = vmatprep.subr.bf16.mxu0 %v2363_v60  ;;  %v1163_v54 = vld [vmem:[%s3685_s15 + $0x380] sm:$0xff]  ;;  %v2325_v55 = vpack.c.bf16 %v1156_v48, %v1153_v46  ;;  %v1161_v60 = vld [vmem:[%s3685_s15 + $0x370] sm:$0xff]  ;;  %v1166_v63 = vld [vmem:[%s3685_s15 + $0x398] sm:$0xff] }
 0x54c   :  { %2302 = vmatpush1.bf16.msra.mxu1 %v2301_v17  ;;  %v823_v12 = vrot.slane %v822_v6, 1  ;;  %v832_v23 = vmax.f32 %v830_v7, %v831_v13  ;;  %v2327_v58 = vpack.c.bf16 %v1163_v54, %v1160_v53  ;;  %v1169_v2 = vld [vmem:[%s3685_s15 + $0x3b0] sm:$0xff]  ;;  %v1168_v7 = vld [vmem:[%s3685_s15 + $0x3a8] sm:$0xff] }
 0x54d   :  { %2304 = vmatprep.subr.bf16.mxu1 %v2303_v20  ;;  %v2333_v13 = vpack.c.bf16 %v1168_v7, %v1165_v5  ;;  %v1546_v54 = vld [vmem:[%s3687_s17 + $0x108] sm:$0xff]  ;;  %v1540_v5 = vld [vmem:[%s3687_s17 + $0xd8] sm:$0xff]  ;;  %v1523_v7 = vld [vmem:[%s3687_s17 + $0x50] sm:$0xff] }
 0x54e   :  { %2366 = vmatpush3.bf16.msra.mxu0 %v2365_v3  ;;  %v824_v22 = vmax.f32 %v822_v6, %v823_v12  ;;  %v2329_v3 = vpack.c.bf16 %v1162_v59, %v1159_v57  ;;  %v2331_v6 = vpack.c.bf16 %v1169_v2, %v1166_v63  ;;  %v1170_v12 = vld [vmem:[%s3685_s15 + $0x3b8] sm:$0xff]  ;;  %v1538_v57 = vld [vmem:[%s3687_s17 + $0xc8] sm:$0xff]  ;;  %v1521_v59 = vld [vmem:[%s3687_s17 + $0x40] sm:$0xff] }
 0x54f   :  { %2367 = vmatprep.subr.bf16.mxu0 %v2696_v9  ;;  %v1548_v2 = vld [vmem:[%s3687_s17 + $0x118] sm:$0xff] }
 0x550   :  { %2306 = vmatpush1.bf16.msra.mxu1 %v2305_v32  ;;  %v834_v27 = vsel %vm833_vm13, %v824_v22, %v832_v23  ;;  %v1529_v22 = vld [vmem:[%s3687_s17 + $0x80] sm:$0xff]  ;;  %v1530_v23 = vld [vmem:[%s3687_s17 + $0x88] sm:$0xff] }
 0x551   :  { %2308 = vmatprep.subr.bf16.mxu1 %v2307_v33  ;;  %v1147_v33 = vld [vmem:[%s3685_s15 + $0x300] sm:$0xff] }
 0x552   :  { %v2321_v45 = vpack.c.bf16 %v1150_v36, %v1147_v33  ;;  %v1531_v36 = vld [vmem:[%s3687_s17 + $0x90] sm:$0xff] }
 0x553   :  { %v2383_v38 = vpack.c.bf16 %v1532_v37, %v1531_v36  ;;  %v1543_v37 = vld [vmem:[%s3687_s17 + $0xf0] sm:$0xff] }
 0x554   :  { %2310 = vmatpush1.bf16.msra.mxu1 %v2309_v40 }
 0x555   :  { %2312 = vmatprep.subr.bf16.mxu1 %v2311_v41  ;;  %v1154_v41 = vld [vmem:[%s3685_s15 + $0x338] sm:$0xff] }
 0x556   :  { %v2323_v47 = vpack.c.bf16 %v1157_v42, %v1154_v41  ;;  %v1533_v42 = vld [vmem:[%s3687_s17 + $0xa0] sm:$0xff] }
 0x558   :  { %2314 = vmatpush1.bf16.msra.mxu1 %v2313_v44 }
 0x559   :  { %2316 = vmatprep.subr.bf16.mxu1 %v2315_v56  ;;  %v2371_v56 = vpack.c.bf16 %v1158_v50, %v1155_v49  ;;  %v1519_v49 = vld [vmem:[%s3687_s17 + $0x30] sm:$0xff]  ;;  %v1520_v50 = vld [vmem:[%s3687_s17 + $0x38] sm:$0xff] }
 0x55a   :  { %v2393_v53 = vpack.c.bf16 %v1520_v50, %v1519_v49 }
 0x55c   :  { %2318 = vmatpush1.bf16.msra.mxu1 %v2317_v61  ;;  %v1164_v61 = vld [vmem:[%s3685_s15 + $0x388] sm:$0xff] }
 0x55d   :  { %2320 = vmatprep.subr.bf16.mxu1 %v2319_v8  ;;  %v2374_v4 = vpack.c.bf16 %v1164_v61, %v1161_v60  ;;  %v1167_v8 = vld [vmem:[%s3685_s15 + $0x3a0] sm:$0xff]  ;;  %v1522_v60 = vld [vmem:[%s3687_s17 + $0x48] sm:$0xff]  ;;  %v1547_v61 = vld [vmem:[%s3687_s17 + $0x110] sm:$0xff] }
 0x55e   :  { %v2397_v63 = vpack.c.bf16 %v1522_v60, %v1521_v59 }
 0x604   :  { %v1029_v15 = vpop.f32.mrb[12].mxu0 }
 0x605   :  { %v1030_v17 = vadd.f32 %v1029_v15, %v957_v14  ;;  %v2174_v20 = vpop.f32.mrb[13].mxu0  ;;  %v2377_v14 = vpack.c.bf16 %v1170_v12, %v1167_v8  ;;  %v1172_v15 = vld [vmem:[%s3685_s15 + $0x3c8] sm:$0xf]  ;;  %v1524_v8 = vld [vmem:[%s3687_s17 + $0x58] sm:$0xff]  ;;  %v1549_v12 = vld [vmem:[%s3687_s17 + $0x120] sm:$0xff] }
 0x606   :  { %v1173_v20 = vld [vmem:[%s3685_s15 + $0x3d0] sm:$0xf] }
 0x607   :  { %v1037_v26 = vrot.slane %v1030_v17, 2  ;;  %1034 = vrot.lane.b32.xlu0 %v1030_v17, %s2705_s24  ;;  %v1171_v17 = vld [vmem:[%s3685_s15 + $0x3c0] sm:$0xf] }
 0x609   :  { %1038 = vrot.lane.b32.xlu1 %v1037_v26, %s2706_s7  ;;  %v1513_v26 = vld [vmem:[%s3687_s17] sm:$0xff] }
 0x60b   :  { %1042 = vrot.lane.b32.xlu0 %v834_v27, %s2707_s13  ;;  %v2379_v27 = vpack.c.bf16 %v1530_v23, %v1529_v22  ;;  %v1525_v23 = vld [vmem:[%s3687_s17 + $0x60] sm:$0xff] }
 0x679   :  { %v1035_v32 = vpop.permute.xlu0 %1034 }
 0x67a   :  { %v1046_v51 = vsel %vm1045_vm1, %v816_v39, %v1035_v32  ;;  %v1515_v39 = vld [vmem:[%s3687_s17 + $0x10] sm:$0xff] }
 0x67b   :  { %v1039_v40 = vpop.permute.xlu1 %1038 }
 0x67c   :  { %v1048_v43 = vsel %vm1047_vm14, %v1035_v32, %v1039_v40  ;;  %v1514_v32 = vld [vmem:[%s3687_s17 + $0x8] sm:$0xff]  ;;  %v1516_v40 = vld [vmem:[%s3687_s17 + $0x18] sm:$0xff] }
 0x67d   :  { %v1043_v44 = vpop.permute.xlu0 %1042  ;;  %v2381_v33 = vpack.c.bf16 %v1514_v32, %v1513_v26  ;;  %v2385_v41 = vpack.c.bf16 %v1516_v40, %v1515_v39  ;;  %v1526_v26 = vld [vmem:[%s3687_s17 + $0x68] sm:$0xff]  ;;  %v1528_v40 = vld [vmem:[%s3687_s17 + $0x78] sm:$0xff] }
 0x67e   :  { %v1050_v52 = vsel %vm1049_vm15, %v1048_v43, %v1043_v44  ;;  %v1534_v43 = vld [vmem:[%s3687_s17 + $0xa8] sm:$0xff]  ;;  %v2405_v32 = vpack.c.bf16 %v1526_v26, %v1525_v23 }
 0x67f   :  { %1268 = vmatprep.mubr.f32.mxu1 %v1050_v52  ;;  %1410 = vmatprep.mubr.f32.mxu0 %v1050_v52  ;;  %v1535_v52 = vld [vmem:[%s3687_s17 + $0xb0] sm:$0xff] }
 0x680   :  { %1269 = vmatmul.mubr.f32.vlgmr.msra.gmra.mrb[4].mxu1 %v1046_v51  ;;  %1411 = vmatmul.mubr.f32.vlgmr.msra.gmra.mrb[14].mxu0 %v1046_v51  ;;  %v1545_v51 = vld [vmem:[%s3687_s17 + $0x100] sm:$0xff] }
 0x681   :  { %2322 = vmatpush1.bf16.msra.mxu1 %v2321_v45  ;;  %2369 = vmatpush3.bf16.msra.mxu0 %v2368_v30  ;;  %v1517_v45 = vld [vmem:[%s3687_s17 + $0x20] sm:$0xff]  ;;  %v1518_v30 = vld [vmem:[%s3687_s17 + $0x28] sm:$0xff] }
 0x682   :  { %2324 = vmatprep.subr.bf16.mxu1 %v2323_v47  ;;  %2370 = vmatprep.subr.bf16.mxu0 %v2696_v9  ;;  %v2389_v46 = vpack.c.bf16 %v1518_v30, %v1517_v45  ;;  %v1536_v47 = vld [vmem:[%s3687_s17 + $0xb8] sm:$0xff]  ;;  %v1174_v30 = vld [vmem:[%s3686_s16] sm:$0x7] }
 0x683   :  { %1339 = vmatprep.mubr.f32.mxu1 %v2685_v0  ;;  %2193 = vmatprep.mubr.msk.f32.mxu0 %vm2686_vm0, %v2685_v0  ;;  %v2391_v48 = vpack.c.bf16 %v1536_v47, %v1535_v52  ;;  %v1179_v52 = vrot.slane %v1174_v30, %v845_v34  ;;  %v1183_v47 = vrot.slane %v1174_v30, %v850_v31 }
 0x685   :  { %2326 = vmatpush1.bf16.msra.mxu1 %v2325_v55  ;;  %2372 = vmatpush3.bf16.msra.mxu0 %v2371_v56  ;;  %v2412_v55 = vpack.c.bf16 %v1546_v54, %v1545_v51  ;;  %v1537_v56 = vld [vmem:[%s3687_s17 + $0xc0] sm:$0xff] }
 0x686   :  { %2328 = vmatprep.subr.bf16.mxu1 %v2327_v58  ;;  %2373 = vmatprep.subr.bf16.mxu0 %v2696_v9  ;;  %v2395_v58 = vpack.c.bf16 %v1538_v57, %v1537_v56 }
 0x689   :  { %2330 = vmatpush1.bf16.msra.mxu1 %v2329_v3  ;;  %2375 = vmatpush3.bf16.msra.mxu0 %v2374_v4  ;;  %v2415_v3 = vpack.c.bf16 %v1548_v2, %v1547_v61  ;;  %v1539_v4 = vld [vmem:[%s3687_s17 + $0xd0] sm:$0xff] }
 0x68a   :  { %2332 = vmatprep.subr.bf16.mxu1 %v2331_v6  ;;  %2376 = vmatprep.subr.bf16.mxu0 %v2696_v9  ;;  %v2399_v6 = vpack.c.bf16 %v1540_v5, %v1539_v4 }
 0x68d   :  { %2334 = vmatpush1.bf16.msra.mxu1 %v2333_v13  ;;  %2378 = vmatpush3.bf16.msra.mxu0 %v2377_v14  ;;  %v2401_v13 = vpack.c.bf16 %v1524_v8, %v1523_v7  ;;  %v1550_v14 = vld [vmem:[%s3687_s17 + $0x128] sm:$0xff] }
 0x68e   :  { %1973 = vmatprep.subr.msk.mxu1 %vm1194_vm2, %v1172_v15  ;;  %2191 = vmatprep.subr.mxu0 %v2685_v0  ;;  %v2418_v15 = vpack.c.bf16 %v1550_v14, %v1549_v12 }
 0x691   :  { %1974 = vmatpush1.msk.msra.mxu1 %vm1194_vm2, %v1171_v17  ;;  %2192 = vmatpush3.msk.msra.mxu0 %vm1194_vm2, %v1173_v20  ;;  %v1541_v17 = vld [vmem:[%s3687_s17 + $0xe0] sm:$0xff]  ;;  %v1542_v20 = vld [vmem:[%s3687_s17 + $0xe8] sm:$0xff] }
 0x692   :  { %1975 = vmatmul.mubr.msk.f32.vlgmr.msra.gmra.mrb[4].mxu1 %vm1191_vm3, %v1043_v44  ;;  %2194 = vmatmul.mubr.msk.f32.vlgmr.msra.gmra.mrb[16].mxu0 %vm1191_vm3, %v1043_v44  ;;  %v2387_v44 = vpack.c.bf16 %v1534_v43, %v1533_v42  ;;  %v2403_v22 = vpack.c.bf16 %v1542_v20, %v1541_v17  ;;  %v1553_v42 = vld [vmem:[%s3687_s17 + $0x140] sm:$0xf] }
 0x693   :  { %2411 = vmatprep.subr.bf16.mxu1 %v2696_v9  ;;  %2214 = vmatprep.mubr.msk.f32.mxu1 %vm2686_vm0, %v2685_v0 }
 0x694   :  { %2380 = vmatprep.subr.bf16.mxu0 %v2379_v27  ;;  %2413 = vmatpush3.bf16.msra.mxu1 %v2412_v55  ;;  %v1551_v27 = vld [vmem:[%s3687_s17 + $0x130] sm:$0xff] }
 0x695   :  { %2382 = vmatpush3.bf16.msra.mxu0 %v2381_v33  ;;  %2414 = vmatprep.subr.bf16.mxu1 %v2696_v9  ;;  %v1552_v33 = vld [vmem:[%s3687_s17 + $0x138] sm:$0xff] }
 0x696   :  { %2384 = vmatprep.subr.bf16.mxu0 %v2383_v38  ;;  %v2421_v36 = vpack.c.bf16 %v1552_v33, %v1551_v27  ;;  %v1544_v38 = vld [vmem:[%s3687_s17 + $0xf8] sm:$0xff] }
 0x697   :  { %v2407_v39 = vpack.c.bf16 %v1544_v38, %v1543_v37  ;;  %v1978_v37 = vld [vmem:[#allocation12] ss:$0 sm:$0xff] }
 0x698   :  { %2416 = vmatpush3.bf16.msra.mxu1 %v2415_v3 }
 0x699   :  { %2386 = vmatpush3.bf16.msra.mxu0 %v2385_v41  ;;  %2417 = vmatprep.subr.bf16.mxu1 %v2696_v9 }
 0x69a   :  { %2388 = vmatprep.subr.bf16.mxu0 %v2387_v44 }
 0x69c   :  { %2419 = vmatpush3.bf16.msra.mxu1 %v2418_v15 }
 0x69d   :  { %2390 = vmatpush3.bf16.msra.mxu0 %v2389_v46  ;;  %2420 = vmatprep.subr.bf16.mxu1 %v2696_v9  ;;  %v1527_v9 = vld [vmem:[%s3687_s17 + $0x70] sm:$0xff]  ;;  %v1187_v46 = vrot.slane %v1174_v30, %v859_v62 }
 0x69e   :  { %2392 = vmatprep.subr.bf16.mxu0 %v2391_v48  ;;  %v2409_v41 = vpack.c.bf16 %v1528_v40, %v1527_v9 }
 0x6a0   :  { %2422 = vmatpush3.bf16.msra.mxu1 %v2421_v36 }
 0x6a1   :  { %2394 = vmatpush3.bf16.msra.mxu0 %v2393_v53  ;;  %2212 = vmatprep.subr.mxu1 %v2685_v0 }
 0x6a2   :  { %2396 = vmatprep.subr.bf16.mxu0 %v2395_v58 }
 0x6a4   :  { %2213 = vmatpush3.msk.msra.mxu1 %vm1194_vm2, %v1553_v42 }
 0x6a5   :  { %2398 = vmatpush3.bf16.msra.mxu0 %v2397_v63 }
 0x6a6   :  { %2400 = vmatprep.subr.bf16.mxu0 %v2399_v6 }
 0x6a9   :  { %2402 = vmatpush3.bf16.msra.mxu0 %v2401_v13 }
 0x6aa   :  { %2404 = vmatprep.subr.bf16.mxu0 %v2403_v22 }
 0x6ad   :  { %2406 = vmatpush3.bf16.msra.mxu0 %v2405_v32 }
 0x6ae   :  { %2408 = vmatprep.subr.bf16.mxu0 %v2407_v39 }
 0x6b1   :  { %2410 = vmatpush3.bf16.msra.mxu0 %v2409_v41 }
 0x6b2   :  { %2217 = vmatprep.subr.mxu0 %v2685_v0 }
 0x753   :  { %v2043_v43 = vpop.f32.mrb[14].mxu0 }
 0x754   :  { %v2044_v44 = vpop.f32.mrb[15].mxu0 }
 0x755   :  { %v2045_v45 = vadd.f32 %v2044_v44, %v2043_v43  ;;  %v2488_v43 = vld [vmem:[%s3682_s12] sm:$0xff] }
 0x757   :  { %v1413_v48 = vadd.f32 %v2045_v45, %v1187_v46 }
 0x765   :  { %v1341_v49 = vpop.f32.mrb[4].mxu1  ;;  %v1482_v50 = vpop.f32.mrb[16].mxu0 }
 0x766   :  { %v2439_v51 = vadd.f32 %v1341_v49, %v1179_v52  ;;  %v1483_v53 = vadd.f32 %v1482_v50, %v1413_v48  ;;  %v1343_v54 = vpop.f32.mrb[5].mxu1  ;;  %v2195_v55 = vpop.f32.mrb[17].mxu0 }
 0x767   :  { %v2440_v56 = vadd.f32 %v1343_v54, %v1183_v47 }
 0x768   :  { %v1489_v57 = vmul.f32 %v2439_v51, %v2439_v51  ;;  %v1491_v58 = vmul.f32 %v1483_v53, %v1483_v53  ;;  %v1488_v13 = vmul.f32 0.5, %v1483_v53  ;;  %v1486_v22 = vmul.f32 0.5, %v2439_v51 }
 0x769   :  { %v1490_v59 = vmul.f32 %v2440_v56, %v2440_v56  ;;  %v1487_v17 = vmul.f32 0.5, %v2440_v56 }
 0x76a   :  { %v1492_v60 = vmul.f32 %v2439_v51, %v1489_v57  ;;  %v1494_v61 = vmul.f32 %v1491_v58, %v1483_v53 }
 0x76b   :  { %v1493_v62 = vmul.f32 %v2440_v56, %v1490_v59 }
 0x76c   :  { %v1495_v63 = vmul.f32 0.044715, %v1492_v60  ;;  %v1497_v2 = vmul.f32 0.044715, %v1494_v61 }
 0x76d   :  { %v1496_v34 = vmul.f32 0.044715, %v1493_v62 }
 0x76e   :  { %v1498_v3 = vadd.f32 %v2439_v51, %v1495_v63  ;;  %v1500_v29 = vadd.f32 %v1497_v2, %v1483_v53  ;;  %v1832_v53 = vld [vmem:[#allocation13] sm:$0xff] }
 0x76f   :  { %v1499_v31 = vadd.f32 %v2440_v56, %v1496_v34 }
 0x770   :  { %v1501_v4 = vmul.f32 0.7978846, %v1498_v3  ;;  %v1503_v5 = vmul.f32 0.7978846, %v1500_v29 }
 0x771   :  { %v1502_v6 = vmul.f32 0.7978846, %v1499_v31 }
 0x772   :  { %2482 = vtanh.f32 %v1501_v4 }
 0x773   :  { %2484 = vtanh.f32 %v1503_v5 }
 0x774   :  { %2486 = vtanh.f32 %v1502_v6 }
 0x77c   :  { %v2483_v7 = vpop.eup %2482 }
 0x77d   :  { %v2485_v8 = vpop.eup %2484  ;;  %v1507_v15 = vadd.f32 1.0, %v2483_v7 }
 0x77e   :  { %v2487_v12 = vpop.eup %2486  ;;  %v1509_v14 = vadd.f32 1.0, %v2485_v8 }
 0x77f   :  { %v1508_v20 = vadd.f32 1.0, %v2487_v12  ;;  %v1510_v27 = vmul.f32 %v1507_v15, %v1486_v22 }
 0x780   :  { %v1512_v23 = vmul.f32 %v1509_v14, %v1488_v13 }
 0x781   :  { %v1511_v26 = vmul.f32 %v1508_v20, %v1487_v17 }
 0x782   :  { %2215 = vmatmul.mubr.msk.f32.vlgmr.msra.gmra.mrb[6].mxu1 %vm1191_vm3, %v1512_v23 }
 0x783   :  { %1631 = vmatprep.mubr.f32.mxu0 %v1511_v26  ;;  %2240 = vmatprep.mubr.msk.f32.mxu1 %vm959_vm10, %v1832_v53 }
 0x784   :  { %1632 = vmatmul.mubr.f32.vlgmr.msra.gmra.mrb[18].mxu0 %v1510_v27 }
 0x785   :  { %2219 = vmatprep.mubr.msk.f32.mxu0 %vm2686_vm0, %v2685_v0 }
 0x855   :  { %v1703_v32 = vpop.f32.mrb[6].mxu1 }
 0x856   :  { %v2216_v33 = vpop.f32.mrb[7].mxu1 }
 0x857   :  { %v2088_v36 = vpop.f32.mrb[18].mxu0 }
 0x858   :  { %v2089_v38 = vpop.f32.mrb[19].mxu0 }
 0x859   :  { %v2090_v39 = vadd.f32 %v2089_v38, %v2088_v36 }
 0x85b   :  { %v1634_v9 = vadd.f32 %v2090_v39, %v1978_v37 }
 0x85d   :  { %v1704_v40 = vadd.f32 %v1703_v32, %v1634_v9 }
 0x85f   :  { %v1708_v41 = vmul.f32 0.01, %v1704_v40  ;;  %vm1707_vm4 = vcmp.gt.f32.partialorder %v1704_v40, 0.0 }
 0x861   :  { %v1709_v42 = vsel %vm1707_vm4, %v1704_v40, %v1708_v41 }
 0x862   :  { %2218 = vmatpush3.msk.msra.mxu0 %vm671_vm6, %v1709_v42 }
 0x863   :  { %2220 = vmatmul.mubr.msk.f32.vlgmr.msra.gmra.mrb[20].mxu0 %vm667_vm7, %v2488_v43 }
 0x936   :  { %v1779_v0 = vpop.f32.mrb[20].mxu0 }
 0x937   :  { %v1783_v44 = vmul.f32 %v1779_v0, %v3021_v1  ;;  %v2221_v45 = vpop.f32.mrb[21].mxu0 }
 0x939   :  { %v1784_v30 = vadd.f32 %v1783_v44, %v2976_v18 }
 0x93b   :  { %1786 = vrot.lane.b32.xlu1 %v1784_v30, %s2692_s5 }
 0x9ad   :  { %v1787_v46 = vpop.permute.xlu1 %1786 }
 0x9ae   :  { %v1789_v52 = vsel %vm839_vm8, 0.0, %v1787_v46 }
 0x9af   :  { %v1790_v47 = vsel %vm841_vm9, %v1789_v52, 0.0 }
 0x9b0   :  { %v1793_v48 = vmul.f32 %v1790_v47, %v3044_v16  ;;  %v1792_v49 = vmul.f32 %v1790_v47, %v3037_v10  ;;  %v1795_v1 = vmul.f32 %v1790_v47, %v3052_v21  ;;  %v1794_v50 = vmul.f32 %v1790_v47, %v3039_v11  ;;  %v1916_v11 = vld [vmem:[%s3690_s20 + $0x8] sm:$0xff] }
 0x9b1   :  { %v1797_v18 = vmul.f32 %v1790_v47, %v3060_v25  ;;  %v1796_v51 = vmul.f32 %v1790_v47, %v3048_v19  ;;  %v1799_v10 = vmul.f32 %v1790_v47, %v3066_v28  ;;  %v1798_v16 = vmul.f32 %v1790_v47, %v3058_v24  ;;  %v1915_v19 = vld [vmem:[%s3690_s20] sm:$0xff]  ;;  %v1930_v21 = vld [vmem:[%s3691_s21 + $0x8] sm:$0xff] }
 0x9b2   :  { %1805 = vrot.lane.b32.xlu1 %v1793_v48, %s2698_s23  ;;  %1801 = vrot.lane.b32.xlu0 %v1792_v49, %s2697_s25  ;;  %v1929_v24 = vld [vmem:[%s3691_s21] sm:$0xff]  ;;  %v1791_v25 = vmul.f32 %v1790_v47, %v3078_v35  ;;  %v1833_v35 = vld [vmem:[#allocation13 + $0x8] sm:$0xff] }
 0x9b6   :  { %1813 = vrot.lane.b32.xlu1 %v1795_v1, %s2700_s2  ;;  %1809 = vrot.lane.b32.xlu0 %v1794_v50, %s2699_s22 }
 0x9ba   :  { %1821 = vrot.lane.b32.xlu1 %v1797_v18, %s2702_s28  ;;  %1817 = vrot.lane.b32.xlu0 %v1796_v51, %s2701_s10 }
 0x9be   :  { %1829 = vrot.lane.b32.xlu1 %v1799_v10, %s2704_s3  ;;  %1825 = vrot.lane.b32.xlu0 %v1798_v16, %s2703_s29  ;;  %s3712_s29 = sld [smem:[#allocation27_spill]] }
 0x9c2   :  { %1924 = vperm.xlu1 %2477, %v1916_v11   ;;  %1919 = vperm.xlu0 %2476, %v1915_v19  }
 0x9c6   :  { %1938 = vperm.xlu1 %2477, %v1930_v21   ;;  %1933 = vperm.xlu0 %2476, %v1929_v24  }
 0xa24   :  { %v1806_v28 = vpop.permute.xlu1 %1805  ;;  %v1802_v54 = vpop.permute.xlu0 %1801 }
 0xa25   :  { %v2423_v55 = vpack.c.bf16 %v1802_v54, %v1791_v25 }
 0xa27   :  { %2424 = vmatprep.subr.bf16.mxu1 %v2423_v55 }
 0xa28   :  { %v1814_v56 = vpop.permute.xlu1 %1813  ;;  %v1810_v57 = vpop.permute.xlu0 %1809  ;;  %2426 = vmatpush3.bf16.msra.mxu1 %v2423_v55 }
 0xa29   :  { %v2427_v58 = vpack.c.bf16 %v1810_v57, %v1806_v28 }
 0xa2b   :  { %2428 = vmatprep.subr.bf16.mxu1 %v2427_v58 }
 0xa2c   :  { %v1818_v59 = vpop.permute.xlu0 %1817  ;;  %2430 = vmatpush3.bf16.msra.mxu1 %v2427_v58  ;;  %v1822_v61 = vpop.permute.xlu1 %1821 }
 0xa2d   :  { %v2431_v60 = vpack.c.bf16 %v1818_v59, %v1814_v56 }
 0xa2f   :  { %2432 = vmatprep.subr.bf16.mxu1 %v2431_v60 }
 0xa30   :  { %v1826_v62 = vpop.permute.xlu0 %1825  ;;  %2434 = vmatpush3.bf16.msra.mxu1 %v2431_v60  ;;  %v1830_v2 = vpop.permute.xlu1 %1829 }
 0xa31   :  { %v2435_v63 = vpack.c.bf16 %v1826_v62, %v1822_v61 }
 0xa33   :  { %2436 = vmatprep.subr.bf16.mxu1 %v2435_v63 }
 0xa34   :  { %2438 = vmatpush3.bf16.msra.mxu1 %v2435_v63 }
 0xa35   :  { %2238 = vmatprep.subr.mxu1 %v1830_v2 }
 0xa38   :  { %2239 = vmatpush3.msra.mxu1 %v1830_v2 }
 0xa39   :  { %2241 = vmatmul.mubr.msk.f32.vlgmr.msra.gmra.mrb[8].mxu1 %vm959_vm10, %v1833_v35 }
 0xa41   :  { %v1925_v34 = vpop.permute.xlu1 %1924  ;;  %v1920_v3 = vpop.permute.xlu0 %1919 }
 0xa45   :  { %v1939_v5 = vpop.permute.xlu1 %1938  ;;  %v1934_v7 = vpop.permute.xlu0 %1933 }
 0xb0c   :  { %v2242_v29 = vpop.f32.mrb[8].mxu1 }
 0xb0d   :  { %v1928_v31 = vmul.f32 %v2242_v29, %v1925_v34  ;;  %v1906_v4 = vpop.f32.mrb[9].mxu1 }
 0xb0e   :  { %v1927_v6 = vmul.f32 %v1920_v3, %v1906_v4 }
 0xb0f   :  { %v1942_v8 = vadd.f32 %v1939_v5, %v1928_v31 }
 0xb10   :  { %v1941_v12 = vadd.f32 %v1934_v7, %v1927_v6 }
 0xb11   :  { %vm1944_vm0 = vcmp.gt.f32.partialorder %v1942_v8, 0.0  ;;  %v1946_v13 = vmul.f32 0.01, %v1942_v8 }
 0xb12   :  { %vm1943_vm5 = vcmp.gt.f32.partialorder %v1941_v12, 0.0  ;;  %v1945_v14 = vmul.f32 0.01, %v1941_v12 }
 0xb13   :  { %v1948_v15 = vsel %vm1944_vm0, %v1942_v8, %v1946_v13 }
 0xb14   :  { %1950 = vst.msk [vmem:[%s3712_s29 + $0x8] sm:$0xff] %vm1045_vm1, %v1948_v15  ;;  %v1947_v17 = vsel %vm1943_vm5, %v1941_v12, %v1945_v14 }
 0xb15   :  { %1949 = vst.msk [vmem:[%s3712_s29] sm:$0xff] %vm1045_vm1, %v1947_v17 }
 0xb16   :  { %1955 = vsyncpa [#allocation3], 1 }
 0xb17   :  { %1956 = vsyncpa [#allocation5], 1 }
 0xb18   :  { %1957 = vsyncpa [#allocation8], 1 }
 0xb19   :  { %1958 = vsyncpa [#allocation11], 1 }
 0xb1a   :  { %1959 = vsyncpa [#allocation14], 1 }

</bundles_post_ra>
